<compile_context>
chip_gen: v7x
topology: tpu7x:2x2x1
jax: 0.10.0
libtpu: 0.0.40
codegen_flags: <defaults>
</compile_context>

<pallas_src>
import functools

import jax
import jax.numpy as jnp
import numpy as np
from jax import lax
from jax.experimental import pallas as pl
from jax.experimental.pallas import tpu as pltpu


# ---------------------------------------------------------------------------
# Fused kernel
# ---------------------------------------------------------------------------
def _esa_fused_kernel(sf_ref, df_ref, wm_ref, dwb_ref, pww_ref, pwb_ref,
                      gw_ref, o_ref, xg_ref, *, H, W, C, dilations, guard):
  """One grid step = one image, layout (C, H*W).

  sf_ref, df_ref : (1, C, S)    SF / DF feature maps (S = H*W on lanes)
  wm_ref         : (3, 9, C, S) depthwise 3x3 weights with BN scale AND the
                                zero-padding edge mask folded in per lane
  dwb_ref        : (3, C, 1)    depthwise BN bias
  pww_ref        : (3, C, C, 1) pointwise weights, [blk, cin, cout, 0] (scaled)
  pwb_ref        : (3, C, 1)    pointwise BN bias
  gw_ref         : (C,)         final 1x1 conv weights (C -> 1), SMEM scalars
  o_ref          : (1, C, S)    output
  xg_ref         : (C, S + 2*guard) VMEM scratch with lane guard bands
  """
  S = H * W
  # Zero the scratch so the guard bands hold exact (finite) zeros; their folded
  # weights are zero anyway, this just guarantees 0 * 0 instead of 0 * garbage.
  xg_ref[...] = jnp.zeros_like(xg_ref)

  x = sf_ref[0]  # (C, S) current feature map, stays in VMEM/vregs all the way.

  for b, dil in enumerate(dilations):
    # Stage the current map into the guard-banded scratch (lane-aligned store):
    # every tap below is a static lane slice of it.
    xg_ref[:, guard:guard + S] = x

    # Depthwise dilated 3x3: 9 shifted slices; weights already carry the BN
    # scale and the zero-padding edge mask, so each tap is a single VPU FMA.
    acc = jnp.zeros((C, S), jnp.float32)
    t = 0
    for ki in range(3):
      for kj in range(3):
        off = (ki - 1) * dil * W + (kj - 1) * dil
        shifted = xg_ref[:, guard + off:guard + off + S]        # (C, S)
        acc = acc + shifted * wm_ref[b, t]                      # (C, S) FMA
        t += 1
    y = jnp.maximum(acc + dwb_ref[b], 0.0)                      # BN bias + ReLU

    # Pointwise 1x1 conv as C unrolled VPU FMAs (no MXU at tiny C).
    z = jnp.zeros((C, S), jnp.float32)
    for ci in range(C):
      z = z + pww_ref[b, ci] * y[ci:ci + 1, :]     # (C,1) * (1,S) -> (C,S)
    x = jnp.maximum(z + pwb_ref[b], 0.0)

  # Final 1x1 conv (C -> 1, no bias) from SMEM scalars + sigmoid gate.
  logits = jnp.zeros((1, S), jnp.float32)
  for ci in range(C):
    logits = logits + gw_ref[ci] * x[ci:ci + 1, :]  # scalar * (1,S)
  sa = jax.nn.sigmoid(logits)                       # (1, S), EUP

  o_ref[0] = sa * (df_ref[0] + sf_ref[0])           # (1,S) bcast * (C,S)


# ---------------------------------------------------------------------------
# Wrapper
# ---------------------------------------------------------------------------
def esa_forward(DF, SF, params, dilations=(6, 4, 2)):
  """ESA forward. DF, SF: (N, C, H, W) NCHW float32 -> (N, C, H, W)."""
  N, C, H, W = DF.shape
  S = H * W
  max_off = max(dilations) * (W + 1)          # max |tap offset| in flat layout
  guard = ((max_off + 127) // 128) * 128      # round up -> lane-aligned staging

  kp = pack_esa_params(params, H, W, dilations)
  sf = SF.reshape(N, C, S)
  df = DF.reshape(N, C, S)

  kernel = functools.partial(_esa_fused_kernel, H=H, W=W, C=C,
                             dilations=tuple(dilations), guard=guard)
  out = pl.pallas_call(
      kernel,
      out_shape=jax.ShapeDtypeStruct((N, C, S), jnp.float32),
      grid=(N,),
      in_specs=[
          pl.BlockSpec((1, C, S), lambda n: (n, 0, 0)),            # SF
          pl.BlockSpec((1, C, S), lambda n: (n, 0, 0)),            # DF
          pl.BlockSpec((3, 9, C, S), lambda n: (0, 0, 0, 0)),      # dw weights*mask
          pl.BlockSpec((3, C, 1), lambda n: (0, 0, 0)),            # dw bias
          pl.BlockSpec((3, C, C, 1), lambda n: (0, 0, 0, 0)),      # pw weights
          pl.BlockSpec((3, C, 1), lambda n: (0, 0, 0)),            # pw bias
          pl.BlockSpec(memory_space=pltpu.MemorySpace.SMEM),       # gate weights
      ],
      out_specs=pl.BlockSpec((1, C, S), lambda n: (n, 0, 0)),
      scratch_shapes=[pltpu.VMEM((C, S + 2 * guard), jnp.float32)],
      compiler_params=pltpu.CompilerParams(
          dimension_semantics=("parallel",)),
  )(sf, df, kp["dww_m"], kp["dwb"], kp["pww"], kp["pwb"], kp["gate_w"])
  return out.reshape(N, C, H, W)


# ---------------------------------------------------------------------------
# Parameter construction + packing.  BatchNorm (eval mode) is folded into a
# per-channel scale/bias; the scale (and, for the depthwise convs, the static
# zero-padding edge mask) is folded into the conv weights at pack time so only
# biases are applied in-kernel.
# ---------------------------------------------------------------------------
def _fold_bn(gamma, beta, mean, var, eps=1e-5):
  scale = gamma / jnp.sqrt(var + eps)
  bias = beta - mean * scale
  return scale, bias


def _tap_masks(H, W, dilations):
  """(len(dilations), 9, H*W) f32 zero-padding validity masks per dilated tap."""
  S = H * W
  lane = np.arange(S)
  row, col = lane // W, lane % W
  blocks = []
  for dil in dilations:
    taps = []
    for ki in range(3):
      for kj in range(3):
        dh, dw = (ki - 1) * dil, (kj - 1) * dil
        valid = ((row + dh >= 0) & (row + dh < H) &
                 (col + dw >= 0) & (col + dw < W))
        taps.append(valid.astype(np.float32))
    blocks.append(np.stack(taps))
  return np.stack(blocks)                       # (3, 9, S)


def make_esa_params(key, C):
  ks = jax.random.split(key, 16)
  params = {}
  dsconv_params = []
  ki = 0
  for _ in range(3):  # three DSConv3x3 blocks (dilations 6, 4, 2)
    dww = jax.random.normal(ks[ki], (3, 3, C), jnp.float32) * 0.2; ki += 1
    dw_gamma = 1.0 + 0.1 * jax.random.normal(ks[ki], (C,), jnp.float32); ki += 1
    dw_beta = 0.05 * jax.random.normal(ks[ki], (C,), jnp.float32); ki += 1
    dws, dwb = _fold_bn(dw_gamma, dw_beta, jnp.zeros((C,)), jnp.ones((C,)))
    pww = jax.random.normal(ks[ki], (C, C), jnp.float32) * 0.3; ki += 1  # (Cin, Cout)
    pw_gamma = 1.0 + 0.1 * jax.random.normal(ks[ki], (C,), jnp.float32)
    pw_beta = 0.05 * jax.random.normal(ks[ki], (C,), jnp.float32)
    pws, pwb = _fold_bn(pw_gamma, pw_beta, jnp.zeros((C,)), jnp.ones((C,)))
    dsconv_params.append((dww,
                          dws.reshape(1, 1, C), dwb.reshape(1, 1, C),
                          pww,
                          pws.reshape(1, C), pwb.reshape(1, C)))
  params["dsconv"] = dsconv_params
  params["gate_w"] = jax.random.normal(ks[15], (C, 1), jnp.float32) * 0.3
  return params


def pack_esa_params(params, H, W, dilations):
  """Fold BN scales into the weights, fold the zero-padding masks into the
  depthwise weights, and reshape everything for the (C, H*W) kernel layout."""
  masks = _tap_masks(H, W, dilations)                  # (3, 9, S) numpy {0,1}
  dww_l, dwb_l, pww_l, pwb_l = [], [], [], []
  for bi, (dww, dws, dwb, pww, pws, pwb) in enumerate(params["dsconv"]):
    C = dww.shape[-1]
    dws_v, dwb_v = dws.reshape(C), dwb.reshape(C)
    pws_v, pwb_v = pws.reshape(C), pwb.reshape(C)
    w = (dww * dws_v[None, None, :]).reshape(9, C)     # BN scale folded, tap-major
    wm = w[:, :, None] * jnp.asarray(masks[bi])[:, None, :]   # (9, C, S)
    dww_l.append(wm)
    dwb_l.append(dwb_v.reshape(C, 1))
    pww_l.append((pww * pws_v[None, :])[:, :, None])   # (Cin, Cout, 1), scaled
    pwb_l.append(pwb_v.reshape(C, 1))
  return {
      "dww_m": jnp.stack(dww_l),                       # (3, 9, C, S)
      "dwb": jnp.stack(dwb_l),                         # (3, C, 1)
      "pww": jnp.stack(pww_l),                         # (3, C, C, 1)
      "pwb": jnp.stack(pwb_l),                         # (3, C, 1)
      "gate_w": params["gate_w"].reshape(-1),          # (C,) -> SMEM scalars
  }


# ---------------------------------------------------------------------------
# Pure-JAX reference (NHWC) for correctness check
# ---------------------------------------------------------------------------
def esa_reference(DF, SF, params):
  x = SF
  for dil, p in zip((6, 4, 2), params["dsconv"]):
    dww, dws, dwb, pww, pws, pwb = p
    C = x.shape[-1]
    w_dw = dww.reshape(3, 3, 1, C)
    y = lax.conv_general_dilated(
        x, w_dw, window_strides=(1, 1), padding=((dil, dil), (dil, dil)),
        rhs_dilation=(dil, dil), feature_group_count=C,
        dimension_numbers=("NHWC", "HWIO", "NHWC"))
    y = jnp.maximum(y * dws.reshape(1, 1, 1, C) + dwb.reshape(1, 1, 1, C), 0.0)
    z = lax.conv_general_dilated(
        y, pww.reshape(1, 1, C, C), window_strides=(1, 1), padding="VALID",
        dimension_numbers=("NHWC", "HWIO", "NHWC"))
    x = jnp.maximum(z * pws.reshape(1, 1, 1, C) + pwb.reshape(1, 1, 1, C), 0.0)
  logits = lax.conv_general_dilated(
      x, params["gate_w"].reshape(1, 1, -1, 1), window_strides=(1, 1),
      padding="VALID", dimension_numbers=("NHWC", "HWIO", "NHWC"))
  sa = jax.nn.sigmoid(logits)
  return sa * (DF + SF)


# ---------------------------------------------------------------------------
if __name__ == "__main__":
  N, C, H, W = 2, 4, 16, 16
  key = jax.random.PRNGKey(0)
  k_df, k_sf, k_p = jax.random.split(key, 3)
  # Inputs in NCHW, as in the PyTorch module.
  DF = jax.random.normal(k_df, (N, C, H, W), jnp.float32)
  SF = jax.random.normal(k_sf, (N, C, H, W), jnp.float32)

  params = make_esa_params(k_p, C)

  out = jax.block_until_ready(esa_forward(DF, SF, params))

  DF_nhwc = jnp.transpose(DF, (0, 2, 3, 1))
  SF_nhwc = jnp.transpose(SF, (0, 2, 3, 1))
  ref_nhwc = esa_reference(DF_nhwc, SF_nhwc, params)
  ref = jax.block_until_ready(jnp.transpose(ref_nhwc, (0, 3, 1, 2)))

  np.testing.assert_allclose(np.asarray(out), np.asarray(ref),
                             rtol=1e-4, atol=1e-4)
  print("KERNEL_OK")
</pallas_src>

<mosaic_0001>
module attributes {stable_mosaic.version = 11 : i64} {
  func.func @_esa_fused_kernel(%arg0: i32, %arg1: memref<1x4x256xf32, #tpu.memory_space<vmem>>, %arg2: memref<1x4x256xf32, #tpu.memory_space<vmem>>, %arg3: memref<3x9x4x256xf32, #tpu.memory_space<vmem>>, %arg4: memref<3x4x1xf32, #tpu.memory_space<vmem>>, %arg5: memref<3x4x4x1xf32, #tpu.memory_space<vmem>>, %arg6: memref<3x4x1xf32, #tpu.memory_space<vmem>>, %arg7: memref<4xf32, #tpu.memory_space<smem>>, %arg8: memref<1x4x256xf32, #tpu.memory_space<vmem>>, %arg9: memref<4x512xf32, #tpu.memory_space<vmem>>) attributes {dimension_semantics = [#tpu.dimension_semantics<parallel>], iteration_bounds = array<i64: 2>, scalar_prefetch = 0 : i64, scratch_operands = 1 : i64, tpu.core_type = #tpu.core_type<tc>, window_params = [{transform_indices = @transform_0, window_bounds = array<i64: 1, 4, 256>}, {transform_indices = @transform_1, window_bounds = array<i64: 1, 4, 256>}, {pipeline_mode = #tpu.pipeline_mode<synchronous>, transform_indices = @transform_2, window_bounds = array<i64: 3, 9, 4, 256>}, {pipeline_mode = #tpu.pipeline_mode<synchronous>, transform_indices = @transform_3, window_bounds = array<i64: 3, 4, 1>}, {pipeline_mode = #tpu.pipeline_mode<synchronous>, transform_indices = @transform_4, window_bounds = array<i64: 3, 4, 4, 1>}, {pipeline_mode = #tpu.pipeline_mode<synchronous>, transform_indices = @transform_5, window_bounds = array<i64: 3, 4, 1>}, {transform_indices = @transform_6, window_bounds = array<i64: 4>}, {transform_indices = @transform_7, window_bounds = array<i64: 1, 4, 256>}]} {
    %cst = arith.constant 0.000000e+00 : f32
    %0 = vector.broadcast %cst : f32 to vector<4x512xf32>
    %c0 = arith.constant 0 : index
    %c0_0 = arith.constant 0 : index
    %1 = vector.load %arg9[%c0, %c0_0] : memref<4x512xf32, #tpu.memory_space<vmem>>, vector<4x512xf32>
    tpu.vector_store %arg9[%c0, %c0_0], %0 {strides = array<i32>} : memref<4x512xf32, #tpu.memory_space<vmem>>, vector<4x512xf32>,
    %c0_1 = arith.constant 0 : index
    %c0_2 = arith.constant 0 : index
    %c0_3 = arith.constant 0 : index
    %2 = vector.load %arg1[%c0_1, %c0_2, %c0_3] : memref<1x4x256xf32, #tpu.memory_space<vmem>>, vector<1x4x256xf32>
    %3 = vector.shape_cast %2 : vector<1x4x256xf32> to vector<4x256xf32>
    %c0_4 = arith.constant 0 : index
    %c128 = arith.constant 128 : index
    %4 = vector.load %arg9[%c0_4, %c128] : memref<4x512xf32, #tpu.memory_space<vmem>>, vector<4x256xf32>
    tpu.vector_store %arg9[%c0_4, %c128], %3 {strides = array<i32>} : memref<4x512xf32, #tpu.memory_space<vmem>>, vector<4x256xf32>,
    %cst_5 = arith.constant 0.000000e+00 : f32
    %5 = vector.broadcast %cst_5 : f32 to vector<4x256xf32>
    %c0_6 = arith.constant 0 : index
    %c26 = arith.constant 26 : index
    %6 = vector.load %arg9[%c0_6, %c26] : memref<4x512xf32, #tpu.memory_space<vmem>>, vector<4x256xf32>
    %c0_7 = arith.constant 0 : index
    %c0_8 = arith.constant 0 : index
    %c0_9 = arith.constant 0 : index
    %c0_10 = arith.constant 0 : index
    %7 = vector.load %arg3[%c0_7, %c0_8, %c0_9, %c0_10] : memref<3x9x4x256xf32, #tpu.memory_space<vmem>>, vector<1x1x4x256xf32>
    %8 = vector.shape_cast %7 : vector<1x1x4x256xf32> to vector<4x256xf32>
    %9 = arith.mulf %6, %8 : vector<4x256xf32>
    %10 = arith.addf %5, %9 : vector<4x256xf32>
    %c0_11 = arith.constant 0 : index
    %c32 = arith.constant 32 : index
    %11 = vector.load %arg9[%c0_11, %c32] : memref<4x512xf32, #tpu.memory_space<vmem>>, vector<4x256xf32>
    %c0_12 = arith.constant 0 : index
    %c1 = arith.constant 1 : index
    %c0_13 = arith.constant 0 : index
    %c0_14 = arith.constant 0 : index
    %12 = vector.load %arg3[%c0_12, %c1, %c0_13, %c0_14] : memref<3x9x4x256xf32, #tpu.memory_space<vmem>>, vector<1x1x4x256xf32>
    %13 = vector.shape_cast %12 : vector<1x1x4x256xf32> to vector<4x256xf32>
    %14 = arith.mulf %11, %13 : vector<4x256xf32>
    %15 = arith.addf %10, %14 : vector<4x256xf32>
    %c0_15 = arith.constant 0 : index
    %c38 = arith.constant 38 : index
    %16 = vector.load %arg9[%c0_15, %c38] : memref<4x512xf32, #tpu.memory_space<vmem>>, vector<4x256xf32>
    %c0_16 = arith.constant 0 : index
    %c2 = arith.constant 2 : index
    %c0_17 = arith.constant 0 : index
    %c0_18 = arith.constant 0 : index
    %17 = vector.load %arg3[%c0_16, %c2, %c0_17, %c0_18] : memref<3x9x4x256xf32, #tpu.memory_space<vmem>>, vector<1x1x4x256xf32>
    %18 = vector.shape_cast %17 : vector<1x1x4x256xf32> to vector<4x256xf32>
    %19 = arith.mulf %16, %18 : vector<4x256xf32>
    %20 = arith.addf %15, %19 : vector<4x256xf32>
    %c0_19 = arith.constant 0 : index
    %c122 = arith.constant 122 : index
    %21 = vector.load %arg9[%c0_19, %c122] : memref<4x512xf32, #tpu.memory_space<vmem>>, vector<4x256xf32>
    %c0_20 = arith.constant 0 : index
    %c3 = arith.constant 3 : index
    %c0_21 = arith.constant 0 : index
    %c0_22 = arith.constant 0 : index
    %22 = vector.load %arg3[%c0_20, %c3, %c0_21, %c0_22] : memref<3x9x4x256xf32, #tpu.memory_space<vmem>>, vector<1x1x4x256xf32>
    %23 = vector.shape_cast %22 : vector<1x1x4x256xf32> to vector<4x256xf32>
    %24 = arith.mulf %21, %23 : vector<4x256xf32>
    %25 = arith.addf %20, %24 : vector<4x256xf32>
    %c0_23 = arith.constant 0 : index
    %c128_24 = arith.constant 128 : index
    %26 = vector.load %arg9[%c0_23, %c128_24] : memref<4x512xf32, #tpu.memory_space<vmem>>, vector<4x256xf32>
    %c0_25 = arith.constant 0 : index
    %c4 = arith.constant 4 : index
    %c0_26 = arith.constant 0 : index
    %c0_27 = arith.constant 0 : index
    %27 = vector.load %arg3[%c0_25, %c4, %c0_26, %c0_27] : memref<3x9x4x256xf32, #tpu.memory_space<vmem>>, vector<1x1x4x256xf32>
    %28 = vector.shape_cast %27 : vector<1x1x4x256xf32> to vector<4x256xf32>
    %29 = arith.mulf %26, %28 : vector<4x256xf32>
    %30 = arith.addf %25, %29 : vector<4x256xf32>
    %c0_28 = arith.constant 0 : index
    %c134 = arith.constant 134 : index
    %31 = vector.load %arg9[%c0_28, %c134] : memref<4x512xf32, #tpu.memory_space<vmem>>, vector<4x256xf32>
    %c0_29 = arith.constant 0 : index
    %c5 = arith.constant 5 : index
    %c0_30 = arith.constant 0 : index
    %c0_31 = arith.constant 0 : index
    %32 = vector.load %arg3[%c0_29, %c5, %c0_30, %c0_31] : memref<3x9x4x256xf32, #tpu.memory_space<vmem>>, vector<1x1x4x256xf32>
    %33 = vector.shape_cast %32 : vector<1x1x4x256xf32> to vector<4x256xf32>
    %34 = arith.mulf %31, %33 : vector<4x256xf32>
    %35 = arith.addf %30, %34 : vector<4x256xf32>
    %c0_32 = arith.constant 0 : index
    %c218 = arith.constant 218 : index
    %36 = vector.load %arg9[%c0_32, %c218] : memref<4x512xf32, #tpu.memory_space<vmem>>, vector<4x256xf32>
    %c0_33 = arith.constant 0 : index
    %c6 = arith.constant 6 : index
    %c0_34 = arith.constant 0 : index
    %c0_35 = arith.constant 0 : index
    %37 = vector.load %arg3[%c0_33, %c6, %c0_34, %c0_35] : memref<3x9x4x256xf32, #tpu.memory_space<vmem>>, vector<1x1x4x256xf32>
    %38 = vector.shape_cast %37 : vector<1x1x4x256xf32> to vector<4x256xf32>
    %39 = arith.mulf %36, %38 : vector<4x256xf32>
    %40 = arith.addf %35, %39 : vector<4x256xf32>
    %c0_36 = arith.constant 0 : index
    %c224 = arith.constant 224 : index
    %41 = vector.load %arg9[%c0_36, %c224] : memref<4x512xf32, #tpu.memory_space<vmem>>, vector<4x256xf32>
    %c0_37 = arith.constant 0 : index
    %c7 = arith.constant 7 : index
    %c0_38 = arith.constant 0 : index
    %c0_39 = arith.constant 0 : index
    %42 = vector.load %arg3[%c0_37, %c7, %c0_38, %c0_39] : memref<3x9x4x256xf32, #tpu.memory_space<vmem>>, vector<1x1x4x256xf32>
    %43 = vector.shape_cast %42 : vector<1x1x4x256xf32> to vector<4x256xf32>
    %44 = arith.mulf %41, %43 : vector<4x256xf32>
    %45 = arith.addf %40, %44 : vector<4x256xf32>
    %c0_40 = arith.constant 0 : index
    %c230 = arith.constant 230 : index
    %46 = vector.load %arg9[%c0_40, %c230] : memref<4x512xf32, #tpu.memory_space<vmem>>, vector<4x256xf32>
    %c0_41 = arith.constant 0 : index
    %c8 = arith.constant 8 : index
    %c0_42 = arith.constant 0 : index
    %c0_43 = arith.constant 0 : index
    %47 = vector.load %arg3[%c0_41, %c8, %c0_42, %c0_43] : memref<3x9x4x256xf32, #tpu.memory_space<vmem>>, vector<1x1x4x256xf32>
    %48 = vector.shape_cast %47 : vector<1x1x4x256xf32> to vector<4x256xf32>
    %49 = arith.mulf %46, %48 : vector<4x256xf32>
    %50 = arith.addf %45, %49 : vector<4x256xf32>
    %c0_44 = arith.constant 0 : index
    %c0_45 = arith.constant 0 : index
    %c0_46 = arith.constant 0 : index
    %51 = vector.load %arg4[%c0_44, %c0_45, %c0_46] : memref<3x4x1xf32, #tpu.memory_space<vmem>>, vector<1x4x1xf32>
    %52 = vector.shape_cast %51 : vector<1x4x1xf32> to vector<4x1xf32>
    %53 = vector.broadcast %52 : vector<4x1xf32> to vector<4x256xf32>
    %54 = arith.addf %50, %53 : vector<4x256xf32>
    %cst_47 = arith.constant 0.000000e+00 : f32
    %55 = vector.broadcast %cst_47 : f32 to vector<4x256xf32>
    %56 = arith.maximumf %54, %55 : vector<4x256xf32>
    %cst_48 = arith.constant 0.000000e+00 : f32
    %57 = vector.broadcast %cst_48 : f32 to vector<4x256xf32>
    %c0_49 = arith.constant 0 : index
    %c0_50 = arith.constant 0 : index
    %c0_51 = arith.constant 0 : index
    %c0_52 = arith.constant 0 : index
    %58 = vector.load %arg5[%c0_49, %c0_50, %c0_51, %c0_52] : memref<3x4x4x1xf32, #tpu.memory_space<vmem>>, vector<1x1x4x1xf32>
    %59 = vector.shape_cast %58 : vector<1x1x4x1xf32> to vector<4x1xf32>
    %60 = vector.extract_strided_slice %56 {offsets = [0, 0], sizes = [1, 256], strides = [1, 1]} : vector<4x256xf32> to vector<1x256xf32>
    %61 = vector.broadcast %59 : vector<4x1xf32> to vector<4x256xf32>
    %62 = vector.broadcast %60 : vector<1x256xf32> to vector<4x256xf32>
    %63 = arith.mulf %61, %62 : vector<4x256xf32>
    %64 = arith.addf %57, %63 : vector<4x256xf32>
    %c0_53 = arith.constant 0 : index
    %c1_54 = arith.constant 1 : index
    %c0_55 = arith.constant 0 : index
    %c0_56 = arith.constant 0 : index
    %65 = vector.load %arg5[%c0_53, %c1_54, %c0_55, %c0_56] : memref<3x4x4x1xf32, #tpu.memory_space<vmem>>, vector<1x1x4x1xf32>
    %66 = vector.shape_cast %65 : vector<1x1x4x1xf32> to vector<4x1xf32>
    %67 = vector.extract_strided_slice %56 {offsets = [1, 0], sizes = [1, 256], strides = [1, 1]} : vector<4x256xf32> to vector<1x256xf32>
    %68 = vector.broadcast %66 : vector<4x1xf32> to vector<4x256xf32>
    %69 = vector.broadcast %67 : vector<1x256xf32> to vector<4x256xf32>
    %70 = arith.mulf %68, %69 : vector<4x256xf32>
    %71 = arith.addf %64, %70 : vector<4x256xf32>
    %c0_57 = arith.constant 0 : index
    %c2_58 = arith.constant 2 : index
    %c0_59 = arith.constant 0 : index
    %c0_60 = arith.constant 0 : index
    %72 = vector.load %arg5[%c0_57, %c2_58, %c0_59, %c0_60] : memref<3x4x4x1xf32, #tpu.memory_space<vmem>>, vector<1x1x4x1xf32>
    %73 = vector.shape_cast %72 : vector<1x1x4x1xf32> to vector<4x1xf32>
    %74 = vector.extract_strided_slice %56 {offsets = [2, 0], sizes = [1, 256], strides = [1, 1]} : vector<4x256xf32> to vector<1x256xf32>
    %75 = vector.broadcast %73 : vector<4x1xf32> to vector<4x256xf32>
    %76 = vector.broadcast %74 : vector<1x256xf32> to vector<4x256xf32>
    %77 = arith.mulf %75, %76 : vector<4x256xf32>
    %78 = arith.addf %71, %77 : vector<4x256xf32>
    %c0_61 = arith.constant 0 : index
    %c3_62 = arith.constant 3 : index
    %c0_63 = arith.constant 0 : index
    %c0_64 = arith.constant 0 : index
    %79 = vector.load %arg5[%c0_61, %c3_62, %c0_63, %c0_64] : memref<3x4x4x1xf32, #tpu.memory_space<vmem>>, vector<1x1x4x1xf32>
    %80 = vector.shape_cast %79 : vector<1x1x4x1xf32> to vector<4x1xf32>
    %81 = vector.extract_strided_slice %56 {offsets = [3, 0], sizes = [1, 256], strides = [1, 1]} : vector<4x256xf32> to vector<1x256xf32>
    %82 = vector.broadcast %80 : vector<4x1xf32> to vector<4x256xf32>
    %83 = vector.broadcast %81 : vector<1x256xf32> to vector<4x256xf32>
    %84 = arith.mulf %82, %83 : vector<4x256xf32>
    %85 = arith.addf %78, %84 : vector<4x256xf32>
    %c0_65 = arith.constant 0 : index
    %c0_66 = arith.constant 0 : index
    %c0_67 = arith.constant 0 : index
    %86 = vector.load %arg6[%c0_65, %c0_66, %c0_67] : memref<3x4x1xf32, #tpu.memory_space<vmem>>, vector<1x4x1xf32>
    %87 = vector.shape_cast %86 : vector<1x4x1xf32> to vector<4x1xf32>
    %88 = vector.broadcast %87 : vector<4x1xf32> to vector<4x256xf32>
    %89 = arith.addf %85, %88 : vector<4x256xf32>
    %cst_68 = arith.constant 0.000000e+00 : f32
    %90 = vector.broadcast %cst_68 : f32 to vector<4x256xf32>
    %91 = arith.maximumf %89, %90 : vector<4x256xf32>
    %c0_69 = arith.constant 0 : index
    %c128_70 = arith.constant 128 : index
    %92 = vector.load %arg9[%c0_69, %c128_70] : memref<4x512xf32, #tpu.memory_space<vmem>>, vector<4x256xf32>
    tpu.vector_store %arg9[%c0_69, %c128_70], %91 {strides = array<i32>} : memref<4x512xf32, #tpu.memory_space<vmem>>, vector<4x256xf32>,
    %cst_71 = arith.constant 0.000000e+00 : f32
    %93 = vector.broadcast %cst_71 : f32 to vector<4x256xf32>
    %c0_72 = arith.constant 0 : index
    %c60 = arith.constant 60 : index
    %94 = vector.load %arg9[%c0_72, %c60] : memref<4x512xf32, #tpu.memory_space<vmem>>, vector<4x256xf32>
    %c1_73 = arith.constant 1 : index
    %c0_74 = arith.constant 0 : index
    %c0_75 = arith.constant 0 : index
    %c0_76 = arith.constant 0 : index
    %95 = vector.load %arg3[%c1_73, %c0_74, %c0_75, %c0_76] : memref<3x9x4x256xf32, #tpu.memory_space<vmem>>, vector<1x1x4x256xf32>
    %96 = vector.shape_cast %95 : vector<1x1x4x256xf32> to vector<4x256xf32>
    %97 = arith.mulf %94, %96 : vector<4x256xf32>
    %98 = arith.addf %93, %97 : vector<4x256xf32>
    %c0_77 = arith.constant 0 : index
    %c64 = arith.constant 64 : index
    %99 = vector.load %arg9[%c0_77, %c64] : memref<4x512xf32, #tpu.memory_space<vmem>>, vector<4x256xf32>
    %c1_78 = arith.constant 1 : index
    %c1_79 = arith.constant 1 : index
    %c0_80 = arith.constant 0 : index
    %c0_81 = arith.constant 0 : index
    %100 = vector.load %arg3[%c1_78, %c1_79, %c0_80, %c0_81] : memref<3x9x4x256xf32, #tpu.memory_space<vmem>>, vector<1x1x4x256xf32>
    %101 = vector.shape_cast %100 : vector<1x1x4x256xf32> to vector<4x256xf32>
    %102 = arith.mulf %99, %101 : vector<4x256xf32>
    %103 = arith.addf %98, %102 : vector<4x256xf32>
    %c0_82 = arith.constant 0 : index
    %c68 = arith.constant 68 : index
    %104 = vector.load %arg9[%c0_82, %c68] : memref<4x512xf32, #tpu.memory_space<vmem>>, vector<4x256xf32>
    %c1_83 = arith.constant 1 : index
    %c2_84 = arith.constant 2 : index
    %c0_85 = arith.constant 0 : index
    %c0_86 = arith.constant 0 : index
    %105 = vector.load %arg3[%c1_83, %c2_84, %c0_85, %c0_86] : memref<3x9x4x256xf32, #tpu.memory_space<vmem>>, vector<1x1x4x256xf32>
    %106 = vector.shape_cast %105 : vector<1x1x4x256xf32> to vector<4x256xf32>
    %107 = arith.mulf %104, %106 : vector<4x256xf32>
    %108 = arith.addf %103, %107 : vector<4x256xf32>
    %c0_87 = arith.constant 0 : index
    %c124 = arith.constant 124 : index
    %109 = vector.load %arg9[%c0_87, %c124] : memref<4x512xf32, #tpu.memory_space<vmem>>, vector<4x256xf32>
    %c1_88 = arith.constant 1 : index
    %c3_89 = arith.constant 3 : index
    %c0_90 = arith.constant 0 : index
    %c0_91 = arith.constant 0 : index
    %110 = vector.load %arg3[%c1_88, %c3_89, %c0_90, %c0_91] : memref<3x9x4x256xf32, #tpu.memory_space<vmem>>, vector<1x1x4x256xf32>
    %111 = vector.shape_cast %110 : vector<1x1x4x256xf32> to vector<4x256xf32>
    %112 = arith.mulf %109, %111 : vector<4x256xf32>
    %113 = arith.addf %108, %112 : vector<4x256xf32>
    %c0_92 = arith.constant 0 : index
    %c128_93 = arith.constant 128 : index
    %114 = vector.load %arg9[%c0_92, %c128_93] : memref<4x512xf32, #tpu.memory_space<vmem>>, vector<4x256xf32>
    %c1_94 = arith.constant 1 : index
    %c4_95 = arith.constant 4 : index
    %c0_96 = arith.constant 0 : index
    %c0_97 = arith.constant 0 : index
    %115 = vector.load %arg3[%c1_94, %c4_95, %c0_96, %c0_97] : memref<3x9x4x256xf32, #tpu.memory_space<vmem>>, vector<1x1x4x256xf32>
    %116 = vector.shape_cast %115 : vector<1x1x4x256xf32> to vector<4x256xf32>
    %117 = arith.mulf %114, %116 : vector<4x256xf32>
    %118 = arith.addf %113, %117 : vector<4x256xf32>
    %c0_98 = arith.constant 0 : index
    %c132 = arith.constant 132 : index
    %119 = vector.load %arg9[%c0_98, %c132] : memref<4x512xf32, #tpu.memory_space<vmem>>, vector<4x256xf32>
    %c1_99 = arith.constant 1 : index
    %c5_100 = arith.constant 5 : index
    %c0_101 = arith.constant 0 : index
    %c0_102 = arith.constant 0 : index
    %120 = vector.load %arg3[%c1_99, %c5_100, %c0_101, %c0_102] : memref<3x9x4x256xf32, #tpu.memory_space<vmem>>, vector<1x1x4x256xf32>
    %121 = vector.shape_cast %120 : vector<1x1x4x256xf32> to vector<4x256xf32>
    %122 = arith.mulf %119, %121 : vector<4x256xf32>
    %123 = arith.addf %118, %122 : vector<4x256xf32>
    %c0_103 = arith.constant 0 : index
    %c188 = arith.constant 188 : index
    %124 = vector.load %arg9[%c0_103, %c188] : memref<4x512xf32, #tpu.memory_space<vmem>>, vector<4x256xf32>
    %c1_104 = arith.constant 1 : index
    %c6_105 = arith.constant 6 : index
    %c0_106 = arith.constant 0 : index
    %c0_107 = arith.constant 0 : index
    %125 = vector.load %arg3[%c1_104, %c6_105, %c0_106, %c0_107] : memref<3x9x4x256xf32, #tpu.memory_space<vmem>>, vector<1x1x4x256xf32>
    %126 = vector.shape_cast %125 : vector<1x1x4x256xf32> to vector<4x256xf32>
    %127 = arith.mulf %124, %126 : vector<4x256xf32>
    %128 = arith.addf %123, %127 : vector<4x256xf32>
    %c0_108 = arith.constant 0 : index
    %c192 = arith.constant 192 : index
    %129 = vector.load %arg9[%c0_108, %c192] : memref<4x512xf32, #tpu.memory_space<vmem>>, vector<4x256xf32>
    %c1_109 = arith.constant 1 : index
    %c7_110 = arith.constant 7 : index
    %c0_111 = arith.constant 0 : index
    %c0_112 = arith.constant 0 : index
    %130 = vector.load %arg3[%c1_109, %c7_110, %c0_111, %c0_112] : memref<3x9x4x256xf32, #tpu.memory_space<vmem>>, vector<1x1x4x256xf32>
    %131 = vector.shape_cast %130 : vector<1x1x4x256xf32> to vector<4x256xf32>
    %132 = arith.mulf %129, %131 : vector<4x256xf32>
    %133 = arith.addf %128, %132 : vector<4x256xf32>
    %c0_113 = arith.constant 0 : index
    %c196 = arith.constant 196 : index
    %134 = vector.load %arg9[%c0_113, %c196] : memref<4x512xf32, #tpu.memory_space<vmem>>, vector<4x256xf32>
    %c1_114 = arith.constant 1 : index
    %c8_115 = arith.constant 8 : index
    %c0_116 = arith.constant 0 : index
    %c0_117 = arith.constant 0 : index
    %135 = vector.load %arg3[%c1_114, %c8_115, %c0_116, %c0_117] : memref<3x9x4x256xf32, #tpu.memory_space<vmem>>, vector<1x1x4x256xf32>
    %136 = vector.shape_cast %135 : vector<1x1x4x256xf32> to vector<4x256xf32>
    %137 = arith.mulf %134, %136 : vector<4x256xf32>
    %138 = arith.addf %133, %137 : vector<4x256xf32>
    %c1_118 = arith.constant 1 : index
    %c0_119 = arith.constant 0 : index
    %c0_120 = arith.constant 0 : index
    %139 = vector.load %arg4[%c1_118, %c0_119, %c0_120] : memref<3x4x1xf32, #tpu.memory_space<vmem>>, vector<1x4x1xf32>
    %140 = vector.shape_cast %139 : vector<1x4x1xf32> to vector<4x1xf32>
    %141 = vector.broadcast %140 : vector<4x1xf32> to vector<4x256xf32>
    %142 = arith.addf %138, %141 : vector<4x256xf32>
    %cst_121 = arith.constant 0.000000e+00 : f32
    %143 = vector.broadcast %cst_121 : f32 to vector<4x256xf32>
    %144 = arith.maximumf %142, %143 : vector<4x256xf32>
    %cst_122 = arith.constant 0.000000e+00 : f32
    %145 = vector.broadcast %cst_122 : f32 to vector<4x256xf32>
    %c1_123 = arith.constant 1 : index
    %c0_124 = arith.constant 0 : index
    %c0_125 = arith.constant 0 : index
    %c0_126 = arith.constant 0 : index
    %146 = vector.load %arg5[%c1_123, %c0_124, %c0_125, %c0_126] : memref<3x4x4x1xf32, #tpu.memory_space<vmem>>, vector<1x1x4x1xf32>
    %147 = vector.shape_cast %146 : vector<1x1x4x1xf32> to vector<4x1xf32>
    %148 = vector.extract_strided_slice %144 {offsets = [0, 0], sizes = [1, 256], strides = [1, 1]} : vector<4x256xf32> to vector<1x256xf32>
    %149 = vector.broadcast %147 : vector<4x1xf32> to vector<4x256xf32>
    %150 = vector.broadcast %148 : vector<1x256xf32> to vector<4x256xf32>
    %151 = arith.mulf %149, %150 : vector<4x256xf32>
    %152 = arith.addf %145, %151 : vector<4x256xf32>
    %c1_127 = arith.constant 1 : index
    %c1_128 = arith.constant 1 : index
    %c0_129 = arith.constant 0 : index
    %c0_130 = arith.constant 0 : index
    %153 = vector.load %arg5[%c1_127, %c1_128, %c0_129, %c0_130] : memref<3x4x4x1xf32, #tpu.memory_space<vmem>>, vector<1x1x4x1xf32>
    %154 = vector.shape_cast %153 : vector<1x1x4x1xf32> to vector<4x1xf32>
    %155 = vector.extract_strided_slice %144 {offsets = [1, 0], sizes = [1, 256], strides = [1, 1]} : vector<4x256xf32> to vector<1x256xf32>
    %156 = vector.broadcast %154 : vector<4x1xf32> to vector<4x256xf32>
    %157 = vector.broadcast %155 : vector<1x256xf32> to vector<4x256xf32>
    %158 = arith.mulf %156, %157 : vector<4x256xf32>
    %159 = arith.addf %152, %158 : vector<4x256xf32>
    %c1_131 = arith.constant 1 : index
    %c2_132 = arith.constant 2 : index
    %c0_133 = arith.constant 0 : index
    %c0_134 = arith.constant 0 : index
    %160 = vector.load %arg5[%c1_131, %c2_132, %c0_133, %c0_134] : memref<3x4x4x1xf32, #tpu.memory_space<vmem>>, vector<1x1x4x1xf32>
    %161 = vector.shape_cast %160 : vector<1x1x4x1xf32> to vector<4x1xf32>
    %162 = vector.extract_strided_slice %144 {offsets = [2, 0], sizes = [1, 256], strides = [1, 1]} : vector<4x256xf32> to vector<1x256xf32>
    %163 = vector.broadcast %161 : vector<4x1xf32> to vector<4x256xf32>
    %164 = vector.broadcast %162 : vector<1x256xf32> to vector<4x256xf32>
    %165 = arith.mulf %163, %164 : vector<4x256xf32>
    %166 = arith.addf %159, %165 : vector<4x256xf32>
    %c1_135 = arith.constant 1 : index
    %c3_136 = arith.constant 3 : index
    %c0_137 = arith.constant 0 : index
    %c0_138 = arith.constant 0 : index
    %167 = vector.load %arg5[%c1_135, %c3_136, %c0_137, %c0_138] : memref<3x4x4x1xf32, #tpu.memory_space<vmem>>, vector<1x1x4x1xf32>
    %168 = vector.shape_cast %167 : vector<1x1x4x1xf32> to vector<4x1xf32>
    %169 = vector.extract_strided_slice %144 {offsets = [3, 0], sizes = [1, 256], strides = [1, 1]} : vector<4x256xf32> to vector<1x256xf32>
    %170 = vector.broadcast %168 : vector<4x1xf32> to vector<4x256xf32>
    %171 = vector.broadcast %169 : vector<1x256xf32> to vector<4x256xf32>
    %172 = arith.mulf %170, %171 : vector<4x256xf32>
    %173 = arith.addf %166, %172 : vector<4x256xf32>
    %c1_139 = arith.constant 1 : index
    %c0_140 = arith.constant 0 : index
    %c0_141 = arith.constant 0 : index
    %174 = vector.load %arg6[%c1_139, %c0_140, %c0_141] : memref<3x4x1xf32, #tpu.memory_space<vmem>>, vector<1x4x1xf32>
    %175 = vector.shape_cast %174 : vector<1x4x1xf32> to vector<4x1xf32>
    %176 = vector.broadcast %175 : vector<4x1xf32> to vector<4x256xf32>
    %177 = arith.addf %173, %176 : vector<4x256xf32>
    %cst_142 = arith.constant 0.000000e+00 : f32
    %178 = vector.broadcast %cst_142 : f32 to vector<4x256xf32>
    %179 = arith.maximumf %177, %178 : vector<4x256xf32>
    %c0_143 = arith.constant 0 : index
    %c128_144 = arith.constant 128 : index
    %180 = vector.load %arg9[%c0_143, %c128_144] : memref<4x512xf32, #tpu.memory_space<vmem>>, vector<4x256xf32>
    tpu.vector_store %arg9[%c0_143, %c128_144], %179 {strides = array<i32>} : memref<4x512xf32, #tpu.memory_space<vmem>>, vector<4x256xf32>,
    %cst_145 = arith.constant 0.000000e+00 : f32
    %181 = vector.broadcast %cst_145 : f32 to vector<4x256xf32>
    %c0_146 = arith.constant 0 : index
    %c94 = arith.constant 94 : index
    %182 = vector.load %arg9[%c0_146, %c94] : memref<4x512xf32, #tpu.memory_space<vmem>>, vector<4x256xf32>
    %c2_147 = arith.constant 2 : index
    %c0_148 = arith.constant 0 : index
    %c0_149 = arith.constant 0 : index
    %c0_150 = arith.constant 0 : index
    %183 = vector.load %arg3[%c2_147, %c0_148, %c0_149, %c0_150] : memref<3x9x4x256xf32, #tpu.memory_space<vmem>>, vector<1x1x4x256xf32>
    %184 = vector.shape_cast %183 : vector<1x1x4x256xf32> to vector<4x256xf32>
    %185 = arith.mulf %182, %184 : vector<4x256xf32>
    %186 = arith.addf %181, %185 : vector<4x256xf32>
    %c0_151 = arith.constant 0 : index
    %c96 = arith.constant 96 : index
    %187 = vector.load %arg9[%c0_151, %c96] : memref<4x512xf32, #tpu.memory_space<vmem>>, vector<4x256xf32>
    %c2_152 = arith.constant 2 : index
    %c1_153 = arith.constant 1 : index
    %c0_154 = arith.constant 0 : index
    %c0_155 = arith.constant 0 : index
    %188 = vector.load %arg3[%c2_152, %c1_153, %c0_154, %c0_155] : memref<3x9x4x256xf32, #tpu.memory_space<vmem>>, vector<1x1x4x256xf32>
    %189 = vector.shape_cast %188 : vector<1x1x4x256xf32> to vector<4x256xf32>
    %190 = arith.mulf %187, %189 : vector<4x256xf32>
    %191 = arith.addf %186, %190 : vector<4x256xf32>
    %c0_156 = arith.constant 0 : index
    %c98 = arith.constant 98 : index
    %192 = vector.load %arg9[%c0_156, %c98] : memref<4x512xf32, #tpu.memory_space<vmem>>, vector<4x256xf32>
    %c2_157 = arith.constant 2 : index
    %c2_158 = arith.constant 2 : index
    %c0_159 = arith.constant 0 : index
    %c0_160 = arith.constant 0 : index
    %193 = vector.load %arg3[%c2_157, %c2_158, %c0_159, %c0_160] : memref<3x9x4x256xf32, #tpu.memory_space<vmem>>, vector<1x1x4x256xf32>
    %194 = vector.shape_cast %193 : vector<1x1x4x256xf32> to vector<4x256xf32>
    %195 = arith.mulf %192, %194 : vector<4x256xf32>
    %196 = arith.addf %191, %195 : vector<4x256xf32>
    %c0_161 = arith.constant 0 : index
    %c126 = arith.constant 126 : index
    %197 = vector.load %arg9[%c0_161, %c126] : memref<4x512xf32, #tpu.memory_space<vmem>>, vector<4x256xf32>
    %c2_162 = arith.constant 2 : index
    %c3_163 = arith.constant 3 : index
    %c0_164 = arith.constant 0 : index
    %c0_165 = arith.constant 0 : index
    %198 = vector.load %arg3[%c2_162, %c3_163, %c0_164, %c0_165] : memref<3x9x4x256xf32, #tpu.memory_space<vmem>>, vector<1x1x4x256xf32>
    %199 = vector.shape_cast %198 : vector<1x1x4x256xf32> to vector<4x256xf32>
    %200 = arith.mulf %197, %199 : vector<4x256xf32>
    %201 = arith.addf %196, %200 : vector<4x256xf32>
    %c0_166 = arith.constant 0 : index
    %c128_167 = arith.constant 128 : index
    %202 = vector.load %arg9[%c0_166, %c128_167] : memref<4x512xf32, #tpu.memory_space<vmem>>, vector<4x256xf32>
    %c2_168 = arith.constant 2 : index
    %c4_169 = arith.constant 4 : index
    %c0_170 = arith.constant 0 : index
    %c0_171 = arith.constant 0 : index
    %203 = vector.load %arg3[%c2_168, %c4_169, %c0_170, %c0_171] : memref<3x9x4x256xf32, #tpu.memory_space<vmem>>, vector<1x1x4x256xf32>
    %204 = vector.shape_cast %203 : vector<1x1x4x256xf32> to vector<4x256xf32>
    %205 = arith.mulf %202, %204 : vector<4x256xf32>
    %206 = arith.addf %201, %205 : vector<4x256xf32>
    %c0_172 = arith.constant 0 : index
    %c130 = arith.constant 130 : index
    %207 = vector.load %arg9[%c0_172, %c130] : memref<4x512xf32, #tpu.memory_space<vmem>>, vector<4x256xf32>
    %c2_173 = arith.constant 2 : index
    %c5_174 = arith.constant 5 : index
    %c0_175 = arith.constant 0 : index
    %c0_176 = arith.constant 0 : index
    %208 = vector.load %arg3[%c2_173, %c5_174, %c0_175, %c0_176] : memref<3x9x4x256xf32, #tpu.memory_space<vmem>>, vector<1x1x4x256xf32>
    %209 = vector.shape_cast %208 : vector<1x1x4x256xf32> to vector<4x256xf32>
    %210 = arith.mulf %207, %209 : vector<4x256xf32>
    %211 = arith.addf %206, %210 : vector<4x256xf32>
    %c0_177 = arith.constant 0 : index
    %c158 = arith.constant 158 : index
    %212 = vector.load %arg9[%c0_177, %c158] : memref<4x512xf32, #tpu.memory_space<vmem>>, vector<4x256xf32>
    %c2_178 = arith.constant 2 : index
    %c6_179 = arith.constant 6 : index
    %c0_180 = arith.constant 0 : index
    %c0_181 = arith.constant 0 : index
    %213 = vector.load %arg3[%c2_178, %c6_179, %c0_180, %c0_181] : memref<3x9x4x256xf32, #tpu.memory_space<vmem>>, vector<1x1x4x256xf32>
    %214 = vector.shape_cast %213 : vector<1x1x4x256xf32> to vector<4x256xf32>
    %215 = arith.mulf %212, %214 : vector<4x256xf32>
    %216 = arith.addf %211, %215 : vector<4x256xf32>
    %c0_182 = arith.constant 0 : index
    %c160 = arith.constant 160 : index
    %217 = vector.load %arg9[%c0_182, %c160] : memref<4x512xf32, #tpu.memory_space<vmem>>, vector<4x256xf32>
    %c2_183 = arith.constant 2 : index
    %c7_184 = arith.constant 7 : index
    %c0_185 = arith.constant 0 : index
    %c0_186 = arith.constant 0 : index
    %218 = vector.load %arg3[%c2_183, %c7_184, %c0_185, %c0_186] : memref<3x9x4x256xf32, #tpu.memory_space<vmem>>, vector<1x1x4x256xf32>
    %219 = vector.shape_cast %218 : vector<1x1x4x256xf32> to vector<4x256xf32>
    %220 = arith.mulf %217, %219 : vector<4x256xf32>
    %221 = arith.addf %216, %220 : vector<4x256xf32>
    %c0_187 = arith.constant 0 : index
    %c162 = arith.constant 162 : index
    %222 = vector.load %arg9[%c0_187, %c162] : memref<4x512xf32, #tpu.memory_space<vmem>>, vector<4x256xf32>
    %c2_188 = arith.constant 2 : index
    %c8_189 = arith.constant 8 : index
    %c0_190 = arith.constant 0 : index
    %c0_191 = arith.constant 0 : index
    %223 = vector.load %arg3[%c2_188, %c8_189, %c0_190, %c0_191] : memref<3x9x4x256xf32, #tpu.memory_space<vmem>>, vector<1x1x4x256xf32>
    %224 = vector.shape_cast %223 : vector<1x1x4x256xf32> to vector<4x256xf32>
    %225 = arith.mulf %222, %224 : vector<4x256xf32>
    %226 = arith.addf %221, %225 : vector<4x256xf32>
    %c2_192 = arith.constant 2 : index
    %c0_193 = arith.constant 0 : index
    %c0_194 = arith.constant 0 : index
    %227 = vector.load %arg4[%c2_192, %c0_193, %c0_194] : memref<3x4x1xf32, #tpu.memory_space<vmem>>, vector<1x4x1xf32>
    %228 = vector.shape_cast %227 : vector<1x4x1xf32> to vector<4x1xf32>
    %229 = vector.broadcast %228 : vector<4x1xf32> to vector<4x256xf32>
    %230 = arith.addf %226, %229 : vector<4x256xf32>
    %cst_195 = arith.constant 0.000000e+00 : f32
    %231 = vector.broadcast %cst_195 : f32 to vector<4x256xf32>
    %232 = arith.maximumf %230, %231 : vector<4x256xf32>
    %cst_196 = arith.constant 0.000000e+00 : f32
    %233 = vector.broadcast %cst_196 : f32 to vector<4x256xf32>
    %c2_197 = arith.constant 2 : index
    %c0_198 = arith.constant 0 : index
    %c0_199 = arith.constant 0 : index
    %c0_200 = arith.constant 0 : index
    %234 = vector.load %arg5[%c2_197, %c0_198, %c0_199, %c0_200] : memref<3x4x4x1xf32, #tpu.memory_space<vmem>>, vector<1x1x4x1xf32>
    %235 = vector.shape_cast %234 : vector<1x1x4x1xf32> to vector<4x1xf32>
    %236 = vector.extract_strided_slice %232 {offsets = [0, 0], sizes = [1, 256], strides = [1, 1]} : vector<4x256xf32> to vector<1x256xf32>
    %237 = vector.broadcast %235 : vector<4x1xf32> to vector<4x256xf32>
    %238 = vector.broadcast %236 : vector<1x256xf32> to vector<4x256xf32>
    %239 = arith.mulf %237, %238 : vector<4x256xf32>
    %240 = arith.addf %233, %239 : vector<4x256xf32>
    %c2_201 = arith.constant 2 : index
    %c1_202 = arith.constant 1 : index
    %c0_203 = arith.constant 0 : index
    %c0_204 = arith.constant 0 : index
    %241 = vector.load %arg5[%c2_201, %c1_202, %c0_203, %c0_204] : memref<3x4x4x1xf32, #tpu.memory_space<vmem>>, vector<1x1x4x1xf32>
    %242 = vector.shape_cast %241 : vector<1x1x4x1xf32> to vector<4x1xf32>
    %243 = vector.extract_strided_slice %232 {offsets = [1, 0], sizes = [1, 256], strides = [1, 1]} : vector<4x256xf32> to vector<1x256xf32>
    %244 = vector.broadcast %242 : vector<4x1xf32> to vector<4x256xf32>
    %245 = vector.broadcast %243 : vector<1x256xf32> to vector<4x256xf32>
    %246 = arith.mulf %244, %245 : vector<4x256xf32>
    %247 = arith.addf %240, %246 : vector<4x256xf32>
    %c2_205 = arith.constant 2 : index
    %c2_206 = arith.constant 2 : index
    %c0_207 = arith.constant 0 : index
    %c0_208 = arith.constant 0 : index
    %248 = vector.load %arg5[%c2_205, %c2_206, %c0_207, %c0_208] : memref<3x4x4x1xf32, #tpu.memory_space<vmem>>, vector<1x1x4x1xf32>
    %249 = vector.shape_cast %248 : vector<1x1x4x1xf32> to vector<4x1xf32>
    %250 = vector.extract_strided_slice %232 {offsets = [2, 0], sizes = [1, 256], strides = [1, 1]} : vector<4x256xf32> to vector<1x256xf32>
    %251 = vector.broadcast %249 : vector<4x1xf32> to vector<4x256xf32>
    %252 = vector.broadcast %250 : vector<1x256xf32> to vector<4x256xf32>
    %253 = arith.mulf %251, %252 : vector<4x256xf32>
    %254 = arith.addf %247, %253 : vector<4x256xf32>
    %c2_209 = arith.constant 2 : index
    %c3_210 = arith.constant 3 : index
    %c0_211 = arith.constant 0 : index
    %c0_212 = arith.constant 0 : index
    %255 = vector.load %arg5[%c2_209, %c3_210, %c0_211, %c0_212] : memref<3x4x4x1xf32, #tpu.memory_space<vmem>>, vector<1x1x4x1xf32>
    %256 = vector.shape_cast %255 : vector<1x1x4x1xf32> to vector<4x1xf32>
    %257 = vector.extract_strided_slice %232 {offsets = [3, 0], sizes = [1, 256], strides = [1, 1]} : vector<4x256xf32> to vector<1x256xf32>
    %258 = vector.broadcast %256 : vector<4x1xf32> to vector<4x256xf32>
    %259 = vector.broadcast %257 : vector<1x256xf32> to vector<4x256xf32>
    %260 = arith.mulf %258, %259 : vector<4x256xf32>
    %261 = arith.addf %254, %260 : vector<4x256xf32>
    %c2_213 = arith.constant 2 : index
    %c0_214 = arith.constant 0 : index
    %c0_215 = arith.constant 0 : index
    %262 = vector.load %arg6[%c2_213, %c0_214, %c0_215] : memref<3x4x1xf32, #tpu.memory_space<vmem>>, vector<1x4x1xf32>
    %263 = vector.shape_cast %262 : vector<1x4x1xf32> to vector<4x1xf32>
    %264 = vector.broadcast %263 : vector<4x1xf32> to vector<4x256xf32>
    %265 = arith.addf %261, %264 : vector<4x256xf32>
    %cst_216 = arith.constant 0.000000e+00 : f32
    %266 = vector.broadcast %cst_216 : f32 to vector<4x256xf32>
    %267 = arith.maximumf %265, %266 : vector<4x256xf32>
    %cst_217 = arith.constant 0.000000e+00 : f32
    %268 = vector.broadcast %cst_217 : f32 to vector<1x256xf32>
    %c0_218 = arith.constant 0 : index
    %269 = memref.load %arg7[%c0_218] : memref<4xf32, #tpu.memory_space<smem>>
    %270 = vector.extract_strided_slice %267 {offsets = [0, 0], sizes = [1, 256], strides = [1, 1]} : vector<4x256xf32> to vector<1x256xf32>
    %271 = vector.broadcast %269 : f32 to vector<1x256xf32>
    %272 = arith.mulf %271, %270 : vector<1x256xf32>
    %273 = arith.addf %268, %272 : vector<1x256xf32>
    %c1_219 = arith.constant 1 : index
    %274 = memref.load %arg7[%c1_219] : memref<4xf32, #tpu.memory_space<smem>>
    %275 = vector.extract_strided_slice %267 {offsets = [1, 0], sizes = [1, 256], strides = [1, 1]} : vector<4x256xf32> to vector<1x256xf32>
    %276 = vector.broadcast %274 : f32 to vector<1x256xf32>
    %277 = arith.mulf %276, %275 : vector<1x256xf32>
    %278 = arith.addf %273, %277 : vector<1x256xf32>
    %c2_220 = arith.constant 2 : index
    %279 = memref.load %arg7[%c2_220] : memref<4xf32, #tpu.memory_space<smem>>
    %280 = vector.extract_strided_slice %267 {offsets = [2, 0], sizes = [1, 256], strides = [1, 1]} : vector<4x256xf32> to vector<1x256xf32>
    %281 = vector.broadcast %279 : f32 to vector<1x256xf32>
    %282 = arith.mulf %281, %280 : vector<1x256xf32>
    %283 = arith.addf %278, %282 : vector<1x256xf32>
    %c3_221 = arith.constant 3 : index
    %284 = memref.load %arg7[%c3_221] : memref<4xf32, #tpu.memory_space<smem>>
    %285 = vector.extract_strided_slice %267 {offsets = [3, 0], sizes = [1, 256], strides = [1, 1]} : vector<4x256xf32> to vector<1x256xf32>
    %286 = vector.broadcast %284 : f32 to vector<1x256xf32>
    %287 = arith.mulf %286, %285 : vector<1x256xf32>
    %288 = arith.addf %283, %287 : vector<1x256xf32>
    %289 = arith.negf %288 : vector<1x256xf32>
    %290 = math.exp %289 : vector<1x256xf32>
    %cst_222 = arith.constant 1.000000e+00 : f32
    %291 = vector.broadcast %cst_222 : f32 to vector<1x256xf32>
    %292 = arith.addf %291, %290 : vector<1x256xf32>
    %293 = arith.divf %291, %292 : vector<1x256xf32>
    %c0_223 = arith.constant 0 : index
    %c0_224 = arith.constant 0 : index
    %c0_225 = arith.constant 0 : index
    %294 = vector.load %arg2[%c0_223, %c0_224, %c0_225] : memref<1x4x256xf32, #tpu.memory_space<vmem>>, vector<1x4x256xf32>
    %295 = vector.shape_cast %294 : vector<1x4x256xf32> to vector<4x256xf32>
    %c0_226 = arith.constant 0 : index
    %c0_227 = arith.constant 0 : index
    %c0_228 = arith.constant 0 : index
    %296 = vector.load %arg1[%c0_226, %c0_227, %c0_228] : memref<1x4x256xf32, #tpu.memory_space<vmem>>, vector<1x4x256xf32>
    %297 = vector.shape_cast %296 : vector<1x4x256xf32> to vector<4x256xf32>
    %298 = arith.addf %295, %297 : vector<4x256xf32>
    %299 = vector.broadcast %293 : vector<1x256xf32> to vector<4x256xf32>
    %300 = arith.mulf %299, %298 : vector<4x256xf32>
    %c0_229 = arith.constant 0 : index
    %c0_230 = arith.constant 0 : index
    %c0_231 = arith.constant 0 : index
    %301 = vector.load %arg8[%c0_229, %c0_230, %c0_231] : memref<1x4x256xf32, #tpu.memory_space<vmem>>, vector<1x4x256xf32>
    %302 = vector.shape_cast %301 : vector<1x4x256xf32> to vector<4x256xf32>
    %303 = vector.shape_cast %300 : vector<4x256xf32> to vector<1x4x256xf32>
    tpu.vector_store %arg8[%c0_229, %c0_230, %c0_231], %303 {strides = array<i32>} : memref<1x4x256xf32, #tpu.memory_space<vmem>>, vector<1x4x256xf32>,
    return
  }
  func.func @transform_0(%arg0: i32) -> (i32, i32, i32) {
    %c0_i32 = arith.constant 0 : i32
    %c0_i32_0 = arith.constant 0 : i32
    %c0_i32_1 = arith.constant 0 : i32
    return %arg0, %c0_i32, %c0_i32_0 : i32, i32, i32
  }
  func.func @transform_1(%arg0: i32) -> (i32, i32, i32) {
    %c0_i32 = arith.constant 0 : i32
    %c0_i32_0 = arith.constant 0 : i32
    %c0_i32_1 = arith.constant 0 : i32
    return %arg0, %c0_i32, %c0_i32_0 : i32, i32, i32
  }
  func.func @transform_2(%arg0: i32) -> (i32, i32, i32, i32) {
    %c0_i32 = arith.constant 0 : i32
    %c0_i32_0 = arith.constant 0 : i32
    %c0_i32_1 = arith.constant 0 : i32
    %c0_i32_2 = arith.constant 0 : i32
    %c0_i32_3 = arith.constant 0 : i32
    return %c0_i32, %c0_i32_0, %c0_i32_1, %c0_i32_2 : i32, i32, i32, i32
  }
  func.func @transform_3(%arg0: i32) -> (i32, i32, i32) {
    %c0_i32 = arith.constant 0 : i32
    %c0_i32_0 = arith.constant 0 : i32
    %c0_i32_1 = arith.constant 0 : i32
    %c0_i32_2 = arith.constant 0 : i32
    return %c0_i32, %c0_i32_0, %c0_i32_1 : i32, i32, i32
  }
  func.func @transform_4(%arg0: i32) -> (i32, i32, i32, i32) {
    %c0_i32 = arith.constant 0 : i32
    %c0_i32_0 = arith.constant 0 : i32
    %c0_i32_1 = arith.constant 0 : i32
    %c0_i32_2 = arith.constant 0 : i32
    %c0_i32_3 = arith.constant 0 : i32
    return %c0_i32, %c0_i32_0, %c0_i32_1, %c0_i32_2 : i32, i32, i32, i32
  }
  func.func @transform_5(%arg0: i32) -> (i32, i32, i32) {
    %c0_i32 = arith.constant 0 : i32
    %c0_i32_0 = arith.constant 0 : i32
    %c0_i32_1 = arith.constant 0 : i32
    %c0_i32_2 = arith.constant 0 : i32
    return %c0_i32, %c0_i32_0, %c0_i32_1 : i32, i32, i32
  }
  func.func @transform_6(%arg0: i32) -> i32 {
    %c0_i32 = arith.constant 0 : i32
    %c0_i32_0 = arith.constant 0 : i32
    return %c0_i32 : i32
  }
  func.func @transform_7(%arg0: i32) -> (i32, i32, i32) {
    %c0_i32 = arith.constant 0 : i32
    %c0_i32_0 = arith.constant 0 : i32
    %c0_i32_1 = arith.constant 0 : i32
    return %arg0, %c0_i32, %c0_i32_0 : i32, i32, i32
  }
}

</mosaic_0001>

<bundles_post_ra>
// kernel: tpu_custom_call.1
= control target key start
LH: loop header
LB: loop body
LE: loop exit
PB: predicated region body
PF: predicated region fallthrough
CT: control target
= control target key end

     0   :  { %12 = vsyncpa [#allocation4], 0  ;;  %s2623_s0 = inlined_call_operand.vmem [shape: f32[2,4,256], index: 0, kind: input, shape index: {}]   ;;  %s2624_s1 = inlined_call_operand.vmem [shape: f32[2,4,256], index: 1, kind: input, shape index: {}]   ;;  %s2625_s2 = inlined_call_operand.hbm [shape: f32[3,9,4,256], index: 2, kind: input, shape index: {}]   ;;  %s2626_s3 = inlined_call_operand.vmem [shape: f32[3,4,1], index: 3, kind: input, shape index: {}]   ;;  %s2627_s4 = inlined_call_operand.vmem [shape: f32[3,4,4,1], index: 4, kind: input, shape index: {}]   ;;  %s2628_s5 = inlined_call_operand.vmem [shape: f32[3,4,1], index: 5, kind: input, shape index: {}]   ;;  %s2629_s6 = inlined_call_operand.vmem [shape: f32[4], index: 6, kind: input, shape index: {}]   ;;  %s2630_s7 = inlined_call_operand.hbm [shape: f32[2,4,256], index: 7, kind: output, shape index: {}]  }
   0x1   :  { %13 = vsyncpa [#allocation6], 0 }
   0x2   :  { %14 = vsyncpa [#allocation5], 0 }
   0x3   :  { %16 = vsyncpa [#allocation5 + $0x1], 0  ;;  %s2125_s24 = smov 0   ;;  %s2127_s25 = smov 0  }
   0x4   :  { %s2129_s26 = smov 0   ;;  %s2131_s27 = smov 0  }
   0x5 LB: > { %s2146_s28 = sadd.s32 4294967295, %s2048_s27   ;;  %s1787_s29 = sadd.s32 4294967294, %s2048_s27   ;;  %s2048_s27 = sphi %s2131_s27, %s2664_s27   ;;  %s2044_s26 = sphi %s2129_s26, %s2663_s26   ;;  %s2040_s25 = sphi %s2127_s25, %s2662_s25   ;;  %s2036_s24 = sphi %s2125_s24, %s2661_s24  }
   0x6   : > { %s2150_s30 = sadd.s32 1, %s2048_s27   ;;  %s186_s8 = sadd.s32 1, %s2044_s26 }
   0x7   : > { %s183_s9 = ssub.s32 %s2048_s27, %s2150_s30  ;;  %p196_p0 = scmp.ne.s32.totalorder %s2044_s26, %s2040_s25 }
   0x8   : > { %p184_p1 = scmp.eq.s32.totalorder %s183_s9, 0  ;;  %p197_p2 = scmp.eq.s32.totalorder %s2146_s28, 1 }
   0x9   : > { %p202_p3 = scmp.ne.s32.totalorder %s2040_s25, %s2036_s24  ;;  %p203_p4 = scmp.eq.s32.totalorder %s1787_s29, 1 }
   0xa   : > { %s2161_s10 = scalar_select %p184_p1, %s2044_s26, %s186_s8  }
   0xb   : > { %p2163_p5 = por %p197_p2, %p196_p0  ;;  %p2167_p6 = por %p203_p4, %p202_p3 }
   0xc   : > { %p1788_p7 = scmp.ge.s32.totalorder %s2048_s27, 1  ;;  %p210_p8 = scmp.lt.s32.totalorder %s2048_s27, 3 }
   0xd   : > { %s2644_s11 = scalar_select %p2163_p5, 1, 0 }
   0xe   : > { %s2645_s12 = scalar_select %p2167_p6, 1, 0 }
   0xf   : > { %p2631_p9 = scmp.eq.s32.totalorder %s2146_s28, 0  ;;  %p2174_p10 = pnand %p1788_p7, %p210_p8 }
  0x10   : > { %s2050_s14 = smov [#allocation3]   ;;  %s245_s18 = sshll.u32 %s2629_s6, 4  ;;  %s2189_s18 = int_to_ptr.vmem [resolvable:$true] %s245_s18 }
  0x11   : > { %s2646_s13 = scalar_select %p2174_p10, 1, 0 }
  0x12   : > { %s222_s15 = sshll.u32 %s2050_s14, 4  ;;  %p1839_p11 = pneg %p2174_p10  ;;  %s223_s15 = int_to_ptr.vmem [resolvable:$true] %s222_s15 }
  0x13   : > { %s1935_s22 = scalar_lea.hbm %s2625_s2, 3456 }
  0x14   : > { %p2185_p12 = pnand %p2631_p9, %p1839_p11  ;;  %p1936_p13 = scmp.ne.s32.totalorder %s2625_s2, %s1935_s22 }
  0x15   : > { %p1942_p3 = scmp.lt.u32.totalorder %s1935_s22, %s2625_s2 }
  0x16   : > { %p1937_p0 = pneg %p2185_p12 }
  0x18   : > { %p1938_p1 = pnand %p1937_p0, %p1936_p13 }
  0x1a   : > { %p1939_p2 = pneg %p1938_p1 }
  0x1c   : > { %p1944_p4 = pnand %p1942_p3, %p1939_p2 }
  0x1e   : > { %1947 = shalt.err (!%p1944_p4)
}
  0x1f   : > { %s1948_s14 = scalar_lea.vmem %s223_s15, 3456  ;;  %p1956_p9 = scmp.lt.s32.totalorder %s223_s15, %s223_s15 }
  0x20   : > { %p1949_p7 = scmp.ne.s32.totalorder %s223_s15, %s1948_s14  ;;  %p1957_p6 = scmp.lt.s32.totalorder %s1948_s14, %s1948_s14 }
  0x22   : > { %p1951_p8 = pnand %p1949_p7, %p1937_p0  ;;  %p1958_p5 = por %p1957_p6, %p1956_p9 }
  0x24   : > { %p1952_p11 = pneg %p1951_p8 }
  0x26   : > { %p1959_p10 = pnand %p1958_p5, %p1952_p11 }
  0x28   : > { %1962 = shalt.err (!%p1959_p10)
}
  0x29   : > { %s2051_s16 = smov 128   ;;  %s2052_s17 = smov 8  }
  0x2a   : > { %1842 = dma.hbm_to_vmem [thread:$0]  (!%p2185_p12), %s2625_s2, 3456, %s223_s15, [#allocation4], %s2051_s16, %s2051_s16, %s2052_s17  }
  0x2b   : > { %s1963_s22 = scalar_lea.vmem %s2189_s18, 16  ;;  %p1971_p5 = scmp.lt.s32.totalorder %s2189_s18, %s2189_s18 }
  0x2c   : > { %p1964_p13 = scmp.ne.s32.totalorder %s2189_s18, %s1963_s22  ;;  %p1972_p9 = scmp.lt.s32.totalorder %s1963_s22, %s1963_s22 }
  0x2e   : > { %p1966_p1 = pnand %p1964_p13, %p1937_p0  ;;  %p1973_p10 = por %p1972_p9, %p1971_p5 }
  0x30   : > { %p1967_p6 = pneg %p1966_p1 }
  0x32   : > { %p1974_p2 = pnand %p1973_p10, %p1967_p6 }
  0x34   : > { %1977 = shalt.err (!%p1974_p2)
}
  0x35   : > { %s2053_s23 = smov [#allocation7]   ;;  %p2648_p3 = scmp.ne.s32.totalorder %s2646_s13, 0 }
  0x36   : > { %1845 = dma.vmem_to_smem (!%p2185_p12), %s2189_s18, 16, %s2053_s23, [#allocation6]  }
  0x37   : > { %274 = sbr.rel (%p2648_p3) target bundleno = 1142 (0x476), region = 48  ;;  %p2649_p4 = scmp.eq.s32.totalorder (!%p2648_p3), %s2146_s28, 0 }
  0x3e   : > { %2023 = dma.done.wait (%p2649_p4), [#allocation4], 3456   ;;  %p2650_p0 = pmov %p2649_p4 }
  0x40   : > { %2025 = vsyncadd (%p2650_p0), [#allocation4], 4294963840  ;;  %p2651_p7 = pmov %p2650_p0 }
  0x41   : > { %p2652_p8 = pmov %p2650_p0 }
  0x42   : > { %2027 = dma.done.wait (%p2651_p7), [#allocation6], 16  }
  0x43   : > { %2029 = vsyncadd (%p2652_p8), [#allocation6], 4294967280 }
  0x44   : > { %284 = sfence }
  0x45   : > { %v346_v0 = vld [vmem:[#allocation3 + $0x8] sm:$0xff]  ;;  %v401_v1 = vld [vmem:[#allocation3 + $0x18] sm:$0xff]  ;;  %s2635_s15 = smov 32   ;;  %v2055_v2 = vmov 0.0   ;;  %v374_v3 = vld [vmem:[#allocation3 + $0x10] sm:$0xff]  ;;  %s2056_s13 = smov 122  }
  0x46   : > { %348 = vrot.lane.b32.xlu0 %v346_v0, %s2635_s15  ;;  %326 = vst [vmem:[#allocation2] sm:$0xff] %v2055_v2  ;;  %327 = vst [vmem:[#allocation2 + $0x8] sm:$0xff] %v2055_v2  ;;  %403 = vrot.lane.b32.xlu1 %v401_v1, %s2056_s13  ;;  %v2057_v4 = vmov 0   ;;  %v441_v5 = vld [vmem:[#allocation3 + $0x28] sm:$0xff]  ;;  %p316_p12 = scmp.lt.s32.totalorder %s2146_s28, 1  ;;  %s2058_s18 = smov 38  }
  0x47   : > { %1921 = vset.pattern.permute.xlu0 %v2057_v4  ;;  %1922 = vset.pattern.permute.xlu1 %v2057_v4  ;;  %s2059_s29 = smov 6   ;;  %v467_v6 = vld [vmem:[#allocation3 + $0x30] sm:$0xff]  ;;  %v494_v7 = vld [vmem:[#allocation3 + $0x38] sm:$0xff]  ;;  %s2060_s17 = smov 90   ;;  %v521_v9 = vld [vmem:[#allocation3 + $0x40] sm:$0xff]  ;;  %vm351_vm0 = vcmask 261120  }
  0x48   : > { %s2237_s19 = scalar_select %p316_p12, %s2146_s28, 1  ;;  %v427_v10 = vld [vmem:[#allocation3 + $0x20] sm:$0xff]  ;;  %v547_v13 = vld [vmem:[%s2626_s3] sm:$0xf]  ;;  %vm379_vm1 = vcmask 310272   ;;  %vm367_vm2 = vcmask 998400  }
  0x49   : > { %s2061_s20 = smov 96   ;;  %v332_v11 = vld [vmem:[#allocation3] sm:$0xff]  ;;  %s2062_s21 = smov 102   ;;  %vm472_vm3 = vcmask 736256   ;;  %vm446_vm4 = vcmask 48128   ;;  %vm499_vm5 = vcmask 785408  }
  0x4a   : > { %376 = vrot.lane.b32.xlu0 %v374_v3, %s2058_s18  ;;  %443 = vrot.lane.b32.xlu1 %v441_v5, %s2059_s29  ;;  %s2634_s8 = sshll.u32 %s2237_s19, 3  ;;  %s2063_s22 = smov 26   ;;  %vm526_vm6 = vcmask 834560   ;;  %v1800_v50 = vld [vmem:[%s2627_s4 + $0x4] sm:$0xf]  ;;  %vm365_vm7 = vcmask 1043456  }
  0x4b   : > { %s2245_s16 = scalar_lea.vmem %s2623_s0, %s2634_s8  ;;  %s2064_s29 = smov 116   ;;  %v1802_v53 = vld [vmem:[%s2627_s4 + $0xc] sm:$0xf]  ;;  %v564_v54 = vld [vmem:[%s2627_s4] sm:$0xf]  ;;  %vm337_vm8 = vcmask 211968  }
  0x4c   : > { %v2248_v8 = vld [vmem:[%s2245_s16] sm:$0xff]  ;;  %s2066_s9 = smov 20   ;;  %s2067_s14 = smov 58   ;;  %v1801_v55 = vld [vmem:[%s2627_s4 + $0x8] sm:$0xf]  ;;  %vm394_vm9 = vcmask 949248  }
  0x4d   : > { %329 = vst [vmem:[#allocation2 + $0x4] sm:$0xff] %v2248_v8  ;;  %v428_v12 = vmul.f32 %v427_v10, %v2248_v8  ;;  %v439_v32 = vld [vmem:[#allocation2 + $0xc] sm:$0xf]  ;;  %v725_v56 = vld [vmem:[%s2628_s5] sm:$0xf]  ;;  %vm459_vm10 = vcmask 162816  }
  0x4e   : > { %469 = vrot.lane.b32.xlu0 %v467_v6, %s2060_s17  ;;  %496 = vrot.lane.b32.xlu1 %v494_v7, %s2061_s20  ;;  %s2068_s17 = smov 52   ;;  %vm487_vm11 = vcmask 523264   ;;  %vm514_vm12 = vcmask 474112   ;;  %vm541_vm13 = vcmask 424960   ;;  %s2071_s8 = smov 4   ;;  %vm799_vm14 = vcmask 556032  }
  0x4f   : > { %vm787_vm15 = vcmask 1014784   ;;  %s2079_s18 = smov 30   ;;  %s2082_s23 = smov 92  }
  0x50   : > { %p2659_p13 = scmp.ne.s32.totalorder %s2644_s11, 0 }
  0x52   : > { %523 = vrot.lane.b32.xlu0 %v521_v9, %s2062_s21  ;;  %334 = vrot.lane.b32.xlu1 %v332_v11, %s2063_s22 }
  0x54   : > { %v2257_v15 = vld [vmem:[#allocation2 + $0x8] sm:$0xf]  ;;  %v2259_v16 = vld [vmem:[#allocation2] sm:$0xff] }
  0x56   : > { %430 = vrot.lane.b32.xlu0 %v428_v12, %s2063_s22  ;;  %s2075_s22 = smov 56  }
  0x5a   : > { %550 = vperm.xlu0 %1921, %v547_v13  }
  0xb8   : > { %v349_v14 = vpop.permute.xlu0 %348  ;;  %v404_v18 = vpop.permute.xlu1 %403 }
  0xb9   : > { %v350_v17 = vrot.slane %v349_v14, 4  ;;  %v405_v24 = vrot.slane %v404_v18, 4 }
  0xbb   : > { %v352_v19 = vsel %vm351_vm0, %v350_v17, %v349_v14  ;;  %v356_v20 = vmul.f32 %v350_v17, %v2257_v15  ;;  %v406_v30 = vsel %vm367_vm2, %v405_v24, %v404_v18  ;;  %v410_v31 = vmul.f32 %v405_v24, %v2257_v15 }
  0xbc   : > { %v355_v21 = vmul.f32 %v352_v19, %v2259_v16  ;;  %v377_v22 = vpop.permute.xlu0 %376  ;;  %v444_v25 = vpop.permute.xlu1 %443  ;;  %v409_v34 = vmul.f32 %v406_v30, %v2259_v16  ;;  %v555_v30 = vlaneseq }
  0xbd   : > { %v378_v23 = vrot.slane %v377_v22, 4  ;;  %361 = vrot.lane.b32.xlu1 %v356_v20, %s2056_s13  ;;  %v445_v35 = vrot.slane %v444_v25, 4 }
  0xbe   : > { %359 = vrot.lane.b32.xlu0 %v355_v21, %s2056_s13  ;;  %s2065_s13 = smov 64  }
  0xbf   : > { %v380_v26 = vsel %vm379_vm1, %v378_v23, %v377_v22  ;;  %v384_v27 = vmul.f32 %v378_v23, %v2257_v15  ;;  %v451_v38 = vmul.f32 %v445_v35, %v439_v32  ;;  %v447_v44 = vsel %vm446_vm4, %v445_v35, %v444_v25 }
  0xc0   : > { %v383_v28 = vmul.f32 %v380_v26, %v2259_v16  ;;  %v470_v29 = vpop.permute.xlu0 %469  ;;  %v497_v36 = vpop.permute.xlu1 %496  ;;  %v450_v47 = vmul.f32 %v447_v44, %v2248_v8  ;;  %vm866_vm1 = vcmask 31744   ;;  %vm879_vm4 = vcmask 457728  }
  0xc1   : > { %389 = vrot.lane.b32.xlu1 %v384_v27, %s2064_s29  ;;  %v471_v33 = vrot.slane %v470_v29, 4  ;;  %v498_v39 = vrot.slane %v497_v36, 4 }
  0xc2   : > { %387 = vrot.lane.b32.xlu0 %v383_v28, %s2064_s29  ;;  %v2069_v28 = vmov 839922192   ;;  %s2658_s29 = smov 34  }
  0xc3   : > { %v477_v37 = vmul.f32 %v471_v33, %v439_v32  ;;  %v473_v41 = vsel %vm472_vm3, %v471_v33, %v470_v29  ;;  %v504_v42 = vmul.f32 %v498_v39, %v439_v32  ;;  %v500_v48 = vsel %vm499_vm5, %v498_v39, %v497_v36 }
  0xc4   : > { %v524_v40 = vpop.permute.xlu0 %523  ;;  %v476_v45 = vmul.f32 %v473_v41, %v2248_v8  ;;  %v503_v49 = vmul.f32 %v500_v48, %v2248_v8  ;;  %v335_v59 = vpop.permute.xlu1 %334  ;;  %v553_v29 = vunpack.c.l.s4 %v2069_v28  ;;  %vm814_vm3 = vcmask 982016  }
  0xc5   : > { %415 = vrot.lane.b32.xlu1 %v410_v31, %s2635_s15  ;;  %v525_v43 = vrot.slane %v524_v40, 4  ;;  %v336_v1 = vrot.slane %v335_v59, 4 }
  0xc6   : > { %413 = vrot.lane.b32.xlu0 %v409_v34, %s2635_s15  ;;  %s2070_s15 = smov 68  }
  0xc7   : > { %v531_v46 = vmul.f32 %v525_v43, %v439_v32  ;;  %v527_v51 = vsel %vm526_vm6, %v525_v43, %v524_v40  ;;  %v338_v7 = vsel %vm337_vm8, %v336_v1, %v335_v59  ;;  %v342_v10 = vmul.f32 %v336_v1, %v2257_v15 }
  0xc8   : > { %v530_v52 = vmul.f32 %v527_v51, %v2248_v8  ;;  %v431_v57 = vpop.permute.xlu0 %430  ;;  %v341_v14 = vmul.f32 %v338_v7, %v2259_v16 }
  0xc9   : > { %482 = vrot.lane.b32.xlu1 %v477_v37, %s2065_s13  ;;  %v432_v26 = vrot.slane %v431_v57, 4  ;;  %v554_v37 = vunpack.c.0.s8 %v553_v29 }
  0xca   : > { %456 = vrot.lane.b32.xlu0 %v451_v38, %s2066_s9  ;;  %v556_v38 = vshrl.u32 %v555_v30, 7 }
  0xcb   : > { %v433_v34 = vsel %vm337_vm8, %v432_v26, %v431_v57  ;;  %vm1204_vm8 = vcmask 801792  }
  0xcd   : > { %509 = vrot.lane.b32.xlu1 %v504_v42, %s2067_s14 }
  0xce   : > { %480 = vrot.lane.b32.xlu0 %v476_v45, %s2065_s13 }
  0xd1   : > { %454 = vrot.lane.b32.xlu1 %v450_v47, %s2066_s9  ;;  %s2074_s9 = smov 120  }
  0xd2   : > { %536 = vrot.lane.b32.xlu0 %v531_v46, %s2068_s17 }
  0xd5   : > { %507 = vrot.lane.b32.xlu1 %v503_v49, %s2067_s14  ;;  %s2640_s14 = smov 34  }
  0xd6   : > { %609 = vperm.xlu0 %1921, %v1800_v50   ;;  %v2308_v50 = vsub.s32 %v554_v37, %v556_v38 }
  0xd9   : > { %534 = vrot.lane.b32.xlu1 %v530_v52, %s2068_s17  ;;  %v2296_v58 = vpop.permute.xlu0 %550  ;;  %s2638_s17 = smov 124  }
  0xda   : > { %689 = vperm.xlu0 %1921, %v1802_v53  }
  0xdd   : > { %567 = vperm.xlu1 %1922, %v564_v54  }
  0xe1   : > { %649 = vperm.xlu1 %1922, %v1801_v55  }
  0xe5   : > { %728 = vperm.xlu1 %1922, %v725_v56  }
 0x12f   : > { %v362_v60 = vpop.permute.xlu1 %361 }
 0x130   : > { %v360_v61 = vpop.permute.xlu0 %359  ;;  %v364_v62 = vrot.slane %v362_v60, 4  ;;  %v372_v21 = vadd.f32 %v362_v60, %v342_v10 }
 0x131   : > { %v363_v63 = vrot.slane %v360_v61, 4 }
 0x133   : > { %v390_v0 = vpop.permute.xlu1 %389  ;;  %v366_v5 = vsel %vm365_vm7, %v363_v63, %v364_v62 }
 0x134   : > { %v388_v2 = vpop.permute.xlu0 %387  ;;  %v392_v3 = vrot.slane %v390_v0, 4  ;;  %v368_v13 = vsel %vm367_vm2, %v360_v61, %v366_v5  ;;  %v399_v24 = vadd.f32 %v390_v0, %v372_v21  ;;  %v558_v61 = vrot.slane %v2296_v58, %v2308_v50 }
 0x135   : > { %v391_v4 = vrot.slane %v388_v2, 4  ;;  %v371_v22 = vadd.f32 %v368_v13, %v341_v14  ;;  %v2317_v5 = vsub.s32 1, %v556_v38  ;;  %v2335_v21 = vsub.s32 3, %v556_v38 }
 0x136   : > { %vm759_vm2 = vcmask 490496  }
 0x137   : > { %v416_v6 = vpop.permute.xlu1 %415  ;;  %v393_v11 = vsel %vm365_vm7, %v391_v4, %v392_v3  ;;  %v2315_v4 = vsub.s32 0, %v556_v38 }
 0x138   : > { %v418_v8 = vrot.slane %v416_v6, 4  ;;  %v414_v9 = vpop.permute.xlu0 %413  ;;  %v395_v19 = vsel %vm394_vm9, %v388_v2, %v393_v11  ;;  %v424_v31 = vadd.f32 %v416_v6, %v399_v24  ;;  %v2323_v11 = vsub.s32 2, %v556_v38 }
 0x139   : > { %v417_v12 = vrot.slane %v414_v9, 4  ;;  %v398_v25 = vadd.f32 %v395_v19, %v371_v22  ;;  %vm1192_vm9 = vcmask 1031168  }
 0x13a   : > { %v437_v39 = vadd.f32 %v432_v26, %v424_v31 }
 0x13b   : > { %v419_v17 = vsel %vm365_vm7, %v417_v12, %v418_v8  ;;  %v483_v18 = vpop.permute.xlu1 %482  ;;  %v2319_v8 = vsub.s32 5, %v556_v38 }
 0x13c   : > { %v457_v20 = vpop.permute.xlu0 %456  ;;  %v420_v23 = vsel %vm351_vm0, %v414_v9, %v419_v17  ;;  %v485_v35 = vrot.slane %v483_v18, 4  ;;  %v2321_v9 = vsub.s32 4, %v556_v38  ;;  %v2329_v17 = vsub.s32 7, %v556_v38 }
 0x13d   : > { %v423_v32 = vadd.f32 %v420_v23, %v398_v25 }
 0x13f   : > { %v510_v15 = vpop.permute.xlu1 %509  ;;  %v436_v40 = vadd.f32 %v433_v34, %v423_v32 }
 0x140   : > { %v481_v27 = vpop.permute.xlu0 %480  ;;  %v512_v48 = vrot.slane %v510_v15, 4 }
 0x141   : > { %v484_v16 = vrot.slane %v481_v27, 4 }
 0x143   : > { %v455_v33 = vpop.permute.xlu1 %454  ;;  %v486_v41 = vsel %vm365_vm7, %v484_v16, %v485_v35 }
 0x144   : > { %v458_v36 = vrot.slane %v455_v33, 4  ;;  %v537_v47 = vpop.permute.xlu0 %536  ;;  %v488_v51 = vsel %vm487_vm11, %v481_v27, %v486_v41 }
 0x145   : > { %v539_v55 = vrot.slane %v537_v47, 4 }
 0x146   : > { %v460_v42 = vsel %vm459_vm10, %v458_v36, %v455_v33  ;;  %v461_v43 = vsel %vm459_vm10, %v458_v36, %v457_v20  ;;  %v2333_v20 = vsub.s32 6, %v556_v38  ;;  %vm1346_vm10 = vcmask 277504  }
 0x147   : > { %v464_v44 = vadd.f32 %v460_v42, %v436_v40  ;;  %v465_v45 = vadd.f32 %v461_v43, %v437_v39  ;;  %v508_v46 = vpop.permute.xlu1 %507 }
 0x148   : > { %v511_v49 = vrot.slane %v508_v46, 4 }
 0x149   : > { %v492_v52 = vadd.f32 %v483_v18, %v465_v45  ;;  %v491_v53 = vadd.f32 %v488_v51, %v464_v44 }
 0x14a   : > { %v513_v54 = vsel %vm365_vm7, %v511_v49, %v512_v48 }
 0x14b   : > { %v515_v56 = vsel %vm514_vm12, %v508_v46, %v513_v54  ;;  %v519_v57 = vadd.f32 %v510_v15, %v492_v52  ;;  %v535_v59 = vpop.permute.xlu1 %534  ;;  %vm1296_vm12 = vcmask 244736  }
 0x14c   : > { %v538_v60 = vrot.slane %v535_v59, 4  ;;  %v518_v63 = vadd.f32 %v515_v56, %v491_v53 }
 0x14d   : > { %v546_v62 = vadd.f32 %v537_v47, %v519_v57 }
 0x14e   : > { %v540_v0 = vsel %vm365_vm7, %v538_v60, %v539_v55 }
 0x14f   : > { %v561_v1 = vadd.f32 %v558_v61, %v546_v62  ;;  %v542_v2 = vsel %vm541_vm13, %v535_v59, %v540_v0  ;;  %vm1283_vm13 = vcmask 752640  }
 0x150   : > { %v545_v3 = vadd.f32 %v542_v2, %v518_v63 }
 0x151   : > { %v563_v6 = vmax.f32 %v561_v1, 0.0 }
 0x152   : > { %v560_v7 = vadd.f32 %v558_v61, %v545_v3 }
 0x153   : > { %v623_v58 = vrot.slane %v563_v6, %v2317_v5  ;;  %v583_v12 = vrot.slane %v563_v6, %v2315_v4  ;;  %v663_v25 = vrot.slane %v563_v6, %v2323_v11  ;;  %v703_v16 = vrot.slane %v563_v6, %v2335_v21 }
 0x154   : > { %v562_v10 = vmax.f32 %v560_v7, 0.0 }
 0x155   : > { %v638_v22 = vrot.slane %v623_v58, %v2317_v5  ;;  %v610_v23 = vpop.permute.xlu0 %609  ;;  %v598_v24 = vrot.slane %v583_v12, %v2315_v4  ;;  %v678_v45 = vrot.slane %v663_v25, %v2323_v11  ;;  %v718_v46 = vrot.slane %v703_v16, %v2335_v21  ;;  %v754_v25 = vld [vmem:[#allocation3 + $0x48] sm:$0xff] }
 0x156   : > { %v615_v13 = vrot.slane %v562_v10, %v2317_v5  ;;  %v619_v14 = vrot.slane %v562_v10, %v2319_v8  ;;  %v575_v18 = vrot.slane %v562_v10, %v2315_v4  ;;  %v579_v19 = vrot.slane %v562_v10, %v2321_v9 }
 0x157   : > { %v695_v27 = vrot.slane %v562_v10, %v2335_v21  ;;  %v699_v28 = vrot.slane %v562_v10, %v2329_v17  ;;  %v655_v31 = vrot.slane %v562_v10, %v2323_v11  ;;  %v659_v32 = vrot.slane %v562_v10, %v2333_v20 }
 0x158   : > { %v630_v15 = vrot.slane %v615_v13, %v2317_v5  ;;  %v634_v26 = vrot.slane %v619_v14, %v2317_v5  ;;  %v590_v29 = vrot.slane %v575_v18, %v2315_v4  ;;  %v594_v30 = vrot.slane %v579_v19, %v2315_v4  ;;  %v794_v13 = vld [vmem:[#allocation3 + $0x58] sm:$0xff]  ;;  %v768_v14 = vld [vmem:[#allocation3 + $0x50] sm:$0xff]  ;;  %v821_v19 = vld [vmem:[#allocation3 + $0x60] sm:$0xff] }
 0x159   : > { %v710_v39 = vrot.slane %v695_v27, %v2335_v21  ;;  %v714_v40 = vrot.slane %v699_v28, %v2335_v21  ;;  %v641_v41 = vmul.f32 %v638_v22, %v610_v23  ;;  %v690_v42 = vpop.permute.xlu0 %689  ;;  %v670_v43 = vrot.slane %v655_v31, %v2323_v11  ;;  %v861_v18 = vld [vmem:[#allocation3 + $0x70] sm:$0xff]  ;;  %v925_v22 = vld [vmem:[#allocation3 + $0x88] sm:$0xff] }
 0x15a   : > { %v639_v37 = vmul.f32 %v630_v15, %v610_v23  ;;  %v640_v38 = vmul.f32 %v634_v26, %v610_v23  ;;  %v674_v44 = vrot.slane %v659_v32, %v2323_v11  ;;  %v721_v57 = vmul.f32 %v718_v46, %v690_v42  ;;  %v900_v23 = vld [vmem:[#allocation3 + $0x80] sm:$0xff]  ;;  %v1803_v15 = vld [vmem:[%s2626_s3 + $0x4] sm:$0xf] }
 0x15b   : > { %v719_v55 = vmul.f32 %v710_v39, %v690_v42  ;;  %v720_v56 = vmul.f32 %v714_v40, %v690_v42 }
 0x15c   : > { %v568_v33 = vpop.permute.xlu1 %567 }
 0x15d   : > { %v599_v34 = vmul.f32 %v590_v29, %v568_v33  ;;  %v600_v35 = vmul.f32 %v594_v30, %v568_v33  ;;  %v601_v36 = vmul.f32 %v598_v24, %v568_v33  ;;  %v887_v24 = vld [vmem:[#allocation3 + $0x78] sm:$0xff] }
 0x15f   : > { %v642_v47 = vadd.f32 %v639_v37, %v599_v34  ;;  %v643_v48 = vadd.f32 %v640_v38, %v600_v35  ;;  %v644_v51 = vadd.f32 %v641_v41, %v601_v36 }
 0x160   : > { %v650_v49 = vpop.permute.xlu1 %649 }
 0x161   : > { %v679_v52 = vmul.f32 %v670_v43, %v650_v49  ;;  %v680_v53 = vmul.f32 %v674_v44, %v650_v49  ;;  %v681_v54 = vmul.f32 %v678_v45, %v650_v49 }
 0x163   : > { %v682_v59 = vadd.f32 %v679_v52, %v642_v47  ;;  %v683_v60 = vadd.f32 %v680_v53, %v643_v48  ;;  %v684_v61 = vadd.f32 %v681_v54, %v644_v51  ;;  %v847_v53 = vld [vmem:[#allocation3 + $0x68] sm:$0xff] }
 0x164   : > { %v729_v1 = vpop.permute.xlu1 %728 }
 0x165   : > { %v722_v62 = vadd.f32 %v719_v55, %v682_v59  ;;  %v723_v63 = vadd.f32 %v720_v56, %v683_v60  ;;  %v724_v0 = vadd.f32 %v721_v57, %v684_v61  ;;  %v2393_v59 = vld [vmem:[#allocation2 + $0xc] sm:$0xf] }
 0x167   : > { %v731_v2 = vadd.f32 %v729_v1, %v722_v62  ;;  %v732_v3 = vadd.f32 %v729_v1, %v723_v63  ;;  %v733_v6 = vadd.f32 %v729_v1, %v724_v0 }
 0x169   : > { %v734_v7 = vmax.f32 %v731_v2, 0.0  ;;  %v735_v10 = vmax.f32 %v732_v3, 0.0  ;;  %v736_v58 = vmax.f32 %v733_v6, 0.0  ;;  %v1804_v3 = vld [vmem:[%s2627_s4 + $0x10] sm:$0xf] }
 0x16b   : > { %743 = vrot.lane.b32.xlu1 %v736_v58, %s2062_s21  ;;  %v740_v12 = vcombine.low %v734_v7, %v735_v10  ;;  %v1806_v7 = vld [vmem:[%s2627_s4 + $0x18] sm:$0xf]  ;;  %v1805_v10 = vld [vmem:[%s2627_s4 + $0x14] sm:$0xf]  ;;  %v1808_v58 = vld [vmem:[%s2628_s5 + $0x4] sm:$0xf] }
 0x16d   : > { %741 = vrot.lane.b32.xlu0 %v740_v12, %s2062_s21  ;;  %s2636_s21 = smov 60   ;;  %v1807_v12 = vld [vmem:[%s2627_s4 + $0x1c] sm:$0xf] }
 0x16f   : > { %796 = vrot.lane.b32.xlu1 %v794_v13, %s2070_s15 }
 0x171   : > { %770 = vrot.lane.b32.xlu0 %v768_v14, %s2065_s13 }
 0x173   : > { %863 = vrot.lane.b32.xlu1 %v861_v18, %s2071_s8  ;;  %s2653_s8 = smov 32  }
 0x175   : > { %823 = vrot.lane.b32.xlu0 %v821_v19, %s2638_s17 }
 0x177   : > { %927 = vrot.lane.b32.xlu1 %v925_v22, %s2070_s15 }
 0x179   : > { %902 = vrot.lane.b32.xlu0 %v900_v23, %s2065_s13 }
 0x17b   : > { %889 = vrot.lane.b32.xlu1 %v887_v24, %s2636_s21 }
 0x17d   : > { %756 = vrot.lane.b32.xlu0 %v754_v25, %s2636_s21 }
 0x181   : > { %953 = vperm.xlu0 %1921, %v1803_v15  }
 0x1dd   : > { %v744_v26 = vpop.permute.xlu1 %743 }
 0x1de   : > { %v746_v28 = vrot.slane %v744_v26, 4 }
 0x1df   : > { %v742_v27 = vpop.permute.xlu0 %741 }
 0x1e0   : > { %v745_v29 = vrot.slane %v742_v27, 4 }
 0x1e1   : > { %v797_v33 = vpop.permute.xlu1 %796 }
 0x1e2   : > { %v747_v30 = vsel %vm365_vm7, %v745_v29, %v746_v28  ;;  %v798_v34 = vrot.slane %v797_v33, 4 }
 0x1e3   : > { %v2369_v31 = vsel %vm526_vm6, %v742_v27, %v747_v30  ;;  %v771_v32 = vpop.permute.xlu0 %770  ;;  %vm1270_vm6 = vcmask 15360  }
 0x1e4   : > { %750 = vst [vmem:[#allocation2 + $0x4] sm:$0xff] %v2369_v31  ;;  %v772_v16 = vrot.slane %v771_v32, 4  ;;  %v800_v41 = vsel %vm799_vm14, %v798_v34, %v797_v33  ;;  %v848_v57 = vmul.f32 %v847_v53, %v2369_v31 }
 0x1e5   : > { %v864_v43 = vpop.permute.xlu1 %863 }
 0x1e6   : > { %v773_v38 = vsel %vm487_vm11, %v772_v16, %v771_v32  ;;  %v865_v46 = vrot.slane %v864_v43, 4 }
 0x1e7   : > { %v824_v35 = vpop.permute.xlu0 %823 }
 0x1e8   : > { %v825_v42 = vrot.slane %v824_v35, 4  ;;  %v867_v51 = vsel %vm866_vm1, %v865_v46, %v864_v43  ;;  %v871_v62 = vmul.f32 %v865_v46, %v2393_v59 }
 0x1e9   : > { %v928_v54 = vpop.permute.xlu1 %927  ;;  %v870_v55 = vmul.f32 %v867_v51, %v2369_v31 }
 0x1ea   : > { %v826_v47 = vsel %vm787_vm15, %v825_v42, %v824_v35  ;;  %v929_v60 = vrot.slane %v928_v54, 4 }
 0x1eb   : > { %v2372_v36 = vld [vmem:[#allocation2] sm:$0xff]  ;;  %v2374_v37 = vld [vmem:[#allocation2 + $0x8] sm:$0xf]  ;;  %v903_v52 = vpop.permute.xlu0 %902 }
 0x1ec   : > { %v776_v39 = vmul.f32 %v773_v38, %v2372_v36  ;;  %v777_v40 = vmul.f32 %v772_v16, %v2374_v37  ;;  %v803_v44 = vmul.f32 %v800_v41, %v2372_v36  ;;  %v804_v45 = vmul.f32 %v798_v34, %v2374_v37 }
 0x1ed   : > { %v829_v48 = vmul.f32 %v826_v47, %v2372_v36  ;;  %v830_v49 = vmul.f32 %v825_v42, %v2374_v37  ;;  %v904_v56 = vrot.slane %v903_v52, 4  ;;  %v930_v63 = vsel %vm799_vm14, %v929_v60, %v928_v54  ;;  %v890_v14 = vpop.permute.xlu1 %889 }
 0x1ee   : > { %782 = vrot.lane.b32.xlu0 %v777_v40, %s2638_s17  ;;  %780 = vrot.lane.b32.xlu1 %v776_v39, %s2638_s17  ;;  %v933_v1 = vmul.f32 %v930_v63, %v2369_v31  ;;  %v934_v6 = vmul.f32 %v929_v60, %v2393_v59 }
 0x1ef   : > { %v909_v61 = vmul.f32 %v904_v56, %v2393_v59  ;;  %v905_v0 = vsel %vm487_vm11, %v904_v56, %v903_v52  ;;  %v757_v13 = vpop.permute.xlu0 %756 }
 0x1f0   : > { %v908_v2 = vmul.f32 %v905_v0, %v2369_v31  ;;  %v758_v19 = vrot.slane %v757_v13, 4 }
 0x1f2   : > { %809 = vrot.lane.b32.xlu0 %v804_v45, %s2074_s9  ;;  %807 = vrot.lane.b32.xlu1 %v803_v44, %s2074_s9  ;;  %v760_v26 = vsel %vm759_vm2, %v758_v19, %v757_v13  ;;  %v764_v33 = vmul.f32 %v758_v19, %v2374_v37 }
 0x1f3   : > { %v763_v16 = vmul.f32 %v760_v26, %v2372_v36 }
 0x1f6   : > { %835 = vrot.lane.b32.xlu0 %v830_v49, %s2065_s13  ;;  %833 = vrot.lane.b32.xlu1 %v829_v48, %s2065_s13 }
 0x1fa   : > { %874 = vrot.lane.b32.xlu0 %v870_v55, %s2075_s22  ;;  %850 = vrot.lane.b32.xlu1 %v848_v57, %s2636_s21  ;;  %v891_v55 = vrot.slane %v890_v14, 4  ;;  %s2077_s21 = smov 2  }
 0x1fc   : > { %v892_v0 = vsel %vm759_vm2, %v891_v55, %v890_v14 }
 0x1fd   : > { %v895_v13 = vmul.f32 %v892_v0, %v2369_v31 }
 0x1fe   : > { %876 = vrot.lane.b32.xlu1 %v871_v62, %s2075_s22  ;;  %914 = vrot.lane.b32.xlu0 %v909_v61, %s2638_s17  ;;  %v896_v62 = vmul.f32 %v891_v55, %v2393_v59  ;;  %s313_s22 = sand.u32 1, %s2040_s25  }
 0x200   : > { %v954_v18 = vpop.permute.xlu0 %953 }
 0x202   : > { %937 = vrot.lane.b32.xlu0 %v933_v1, %s2074_s9  ;;  %912 = vrot.lane.b32.xlu1 %v908_v2, %s2638_s17  ;;  %s2076_s17 = smov 98  }
 0x206   : > { %971 = vperm.xlu0 %1921, %v1804_v3   ;;  %939 = vrot.lane.b32.xlu1 %v934_v6, %s2074_s9  ;;  %s2078_s9 = smov 126  }
 0x20a   : > { %1053 = vperm.xlu0 %1921, %v1806_v7   ;;  %1013 = vperm.xlu1 %1922, %v1805_v10  }
 0x20e   : > { %1133 = vperm.xlu0 %1921, %v1808_v58   ;;  %1093 = vperm.xlu1 %1922, %v1807_v12  }
 0x260   : > { %v781_v22 = vpop.permute.xlu1 %780  ;;  %v783_v23 = vpop.permute.xlu0 %782 }
 0x261   : > { %v784_v24 = vrot.slane %v781_v22, 4  ;;  %v785_v25 = vrot.slane %v783_v23, 4  ;;  %v792_v40 = vadd.f32 %v783_v23, %v764_v33 }
 0x263   : > { %v786_v15 = vsel %vm365_vm7, %v784_v24, %v785_v25 }
 0x264   : > { %v808_v27 = vpop.permute.xlu1 %807  ;;  %v810_v28 = vpop.permute.xlu0 %809  ;;  %v788_v32 = vsel %vm787_vm15, %v781_v22, %v786_v15  ;;  %v961_v22 = vrot.slane %v954_v18, %v2308_v50 }
 0x265   : > { %v811_v29 = vrot.slane %v808_v27, 4  ;;  %v812_v30 = vrot.slane %v810_v28, 4  ;;  %v791_v43 = vadd.f32 %v788_v32, %v763_v16  ;;  %v819_v44 = vadd.f32 %v810_v28, %v792_v40 }
 0x267   : > { %v813_v34 = vsel %vm365_vm7, %v811_v29, %v812_v30 }
 0x268   : > { %v834_v35 = vpop.permute.xlu1 %833  ;;  %v836_v38 = vpop.permute.xlu0 %835  ;;  %v815_v39 = vsel %vm814_vm3, %v808_v27, %v813_v34 }
 0x269   : > { %v837_v41 = vrot.slane %v834_v35, 4  ;;  %v838_v42 = vrot.slane %v836_v38, 4  ;;  %v818_v46 = vadd.f32 %v815_v39, %v791_v43  ;;  %v844_v49 = vadd.f32 %v836_v38, %v819_v44 }
 0x26b   : > { %v839_v45 = vsel %vm365_vm7, %v837_v41, %v838_v42 }
 0x26c   : > { %v851_v47 = vpop.permute.xlu1 %850  ;;  %v840_v48 = vsel %vm487_vm11, %v834_v35, %v839_v45  ;;  %v875_v36 = vpop.permute.xlu0 %874 }
 0x26d   : > { %v843_v37 = vadd.f32 %v840_v48, %v818_v46  ;;  %v852_v51 = vrot.slane %v851_v47, 4  ;;  %v878_v54 = vrot.slane %v875_v36, 4 }
 0x26f   : > { %v853_v52 = vsel %vm759_vm2, %v852_v51, %v851_v47  ;;  %v857_v53 = vadd.f32 %v852_v51, %v844_v49  ;;  %v880_v1 = vsel %vm879_vm4, %v878_v54, %v875_v36 }
 0x270   : > { %v877_v56 = vpop.permute.xlu1 %876  ;;  %v915_v57 = vpop.permute.xlu0 %914  ;;  %v856_v60 = vadd.f32 %v853_v52, %v843_v37 }
 0x271   : > { %v881_v61 = vsel %vm879_vm4, %v878_v54, %v877_v56  ;;  %v917_v7 = vrot.slane %v915_v57, 4 }
 0x272   : > { %v885_v63 = vadd.f32 %v881_v61, %v857_v53  ;;  %v884_v6 = vadd.f32 %v880_v1, %v856_v60 }
 0x274   : > { %v898_v2 = vadd.f32 %v896_v62, %v885_v63  ;;  %v913_v3 = vpop.permute.xlu1 %912  ;;  %v938_v12 = vpop.permute.xlu0 %937  ;;  %v897_v24 = vadd.f32 %v895_v13, %v884_v6 }
 0x275   : > { %v916_v10 = vrot.slane %v913_v3, 4  ;;  %v941_v25 = vrot.slane %v938_v12, 4 }
 0x276   : > { %v923_v58 = vadd.f32 %v915_v57, %v898_v2 }
 0x277   : > { %v918_v19 = vsel %vm365_vm7, %v916_v10, %v917_v7 }
 0x278   : > { %v919_v23 = vsel %vm787_vm15, %v913_v3, %v918_v19  ;;  %v940_v59 = vpop.permute.xlu1 %939 }
 0x279   : > { %v942_v14 = vrot.slane %v940_v59, 4  ;;  %v948_v15 = vadd.f32 %v940_v59, %v923_v58  ;;  %v922_v26 = vadd.f32 %v919_v23, %v897_v24 }
 0x27b   : > { %v943_v27 = vsel %vm365_vm7, %v941_v25, %v942_v14  ;;  %v964_v28 = vadd.f32 %v961_v22, %v948_v15 }
 0x27c   : > { %v944_v29 = vsel %vm814_vm3, %v938_v12, %v943_v27 }
 0x27d   : > { %v947_v30 = vadd.f32 %v944_v29, %v922_v26  ;;  %v966_v31 = vmax.f32 %v964_v28, 0.0 }
 0x27f   : > { %v963_v32 = vadd.f32 %v961_v22, %v947_v30  ;;  %v987_v34 = vrot.slane %v966_v31, %v2315_v4  ;;  %v1027_v35 = vrot.slane %v966_v31, %v2317_v5  ;;  %v1067_v40 = vrot.slane %v966_v31, %v2323_v11 }
 0x280   : > { %v1107_v36 = vrot.slane %v966_v31, %v2335_v21 }
 0x281   : > { %v965_v16 = vmax.f32 %v963_v32, 0.0  ;;  %v1002_v46 = vrot.slane %v987_v34, %v2315_v4  ;;  %v1042_v47 = vrot.slane %v1027_v35, %v2317_v5  ;;  %v1082_v51 = vrot.slane %v1067_v40, %v2323_v11  ;;  %v1199_v34 = vld [vmem:[#allocation3 + $0xa0] sm:$0xff]  ;;  %v1173_v35 = vld [vmem:[#allocation3 + $0x98] sm:$0xff]  ;;  %v1316_v40 = vld [vmem:[#allocation3 + $0xc8] sm:$0xff] }
 0x282   : > { %v1122_v19 = vrot.slane %v1107_v36, %v2335_v21 }
 0x283   : > { %v979_v33 = vrot.slane %v965_v16, %v2315_v4  ;;  %v983_v18 = vrot.slane %v965_v16, %v2321_v9  ;;  %v1019_v38 = vrot.slane %v965_v16, %v2317_v5  ;;  %v1023_v39 = vrot.slane %v965_v16, %v2319_v8 }
 0x284   : > { %v1059_v43 = vrot.slane %v965_v16, %v2323_v11  ;;  %v1063_v44 = vrot.slane %v965_v16, %v2333_v20  ;;  %v1099_v48 = vrot.slane %v965_v16, %v2335_v21  ;;  %v1103_v52 = vrot.slane %v965_v16, %v2329_v17 }
 0x285   : > { %v994_v41 = vrot.slane %v979_v33, %v2315_v4  ;;  %v972_v42 = vpop.permute.xlu0 %971  ;;  %v998_v45 = vrot.slane %v983_v18, %v2315_v4  ;;  %v1034_v49 = vrot.slane %v1019_v38, %v2317_v5  ;;  %v1038_v37 = vrot.slane %v1023_v39, %v2317_v5  ;;  %v1265_v38 = vld [vmem:[#allocation3 + $0xb8] sm:$0xff]  ;;  %v1225_v39 = vld [vmem:[#allocation3 + $0xa8] sm:$0xff] }
 0x286   : > { %v1005_v54 = vmul.f32 %v1002_v46, %v972_v42  ;;  %v1074_v56 = vrot.slane %v1059_v43, %v2323_v11  ;;  %v1078_v57 = vrot.slane %v1063_v44, %v2323_v11  ;;  %v1114_v3 = vrot.slane %v1099_v48, %v2335_v21  ;;  %v1341_v43 = vld [vmem:[#allocation3 + $0xd0] sm:$0xff]  ;;  %v1809_v44 = vld [vmem:[%s2626_s3 + $0x8] sm:$0xf] }
 0x287   : > { %v1003_v53 = vmul.f32 %v994_v41, %v972_v42  ;;  %v1004_v61 = vmul.f32 %v998_v45, %v972_v42  ;;  %v1118_v13 = vrot.slane %v1103_v52, %v2335_v21  ;;  %v1291_v41 = vld [vmem:[#allocation3 + $0xc0] sm:$0xff]  ;;  %v1159_v42 = vld [vmem:[#allocation3 + $0x90] sm:$0xff]  ;;  %v1263_v52 = vld [vmem:[#allocation2 + $0xc] sm:$0xf] }
 0x289   : > { %v1014_v55 = vpop.permute.xlu1 %1013  ;;  %v1054_v60 = vpop.permute.xlu0 %1053 }
 0x28a   : > { %v1043_v62 = vmul.f32 %v1034_v49, %v1014_v55  ;;  %v1044_v63 = vmul.f32 %v1038_v37, %v1014_v55  ;;  %v1045_v0 = vmul.f32 %v1042_v47, %v1014_v55  ;;  %v1083_v1 = vmul.f32 %v1074_v56, %v1054_v60 }
 0x28b   : > { %v1084_v2 = vmul.f32 %v1078_v57, %v1054_v60  ;;  %v1085_v58 = vmul.f32 %v1082_v51, %v1054_v60 }
 0x28c   : > { %v1046_v6 = vadd.f32 %v1043_v62, %v1003_v53  ;;  %v1047_v7 = vadd.f32 %v1044_v63, %v1004_v61  ;;  %v1048_v10 = vadd.f32 %v1045_v0, %v1005_v54 }
 0x28d   : > { %v1094_v12 = vpop.permute.xlu1 %1093  ;;  %v1134_v28 = vpop.permute.xlu0 %1133 }
 0x28e   : > { %v1086_v22 = vadd.f32 %v1083_v1, %v1046_v6  ;;  %v1087_v23 = vadd.f32 %v1084_v2, %v1047_v7  ;;  %v1088_v59 = vadd.f32 %v1085_v58, %v1048_v10  ;;  %v1123_v24 = vmul.f32 %v1114_v3, %v1094_v12 }
 0x28f   : > { %v1124_v25 = vmul.f32 %v1118_v13, %v1094_v12  ;;  %v1125_v14 = vmul.f32 %v1122_v19, %v1094_v12 }
 0x290   : > { %v1126_v15 = vadd.f32 %v1123_v24, %v1086_v22 }
 0x291   : > { %v1127_v26 = vadd.f32 %v1124_v25, %v1087_v23  ;;  %v1128_v27 = vadd.f32 %v1125_v14, %v1088_v59 }
 0x292   : > { %v1136_v29 = vadd.f32 %v1134_v28, %v1126_v15 }
 0x293   : > { %v1137_v30 = vadd.f32 %v1134_v28, %v1127_v26  ;;  %v1138_v32 = vadd.f32 %v1134_v28, %v1128_v27 }
 0x294   : > { %v1139_v31 = vmax.f32 %v1136_v29, 0.0  ;;  %v1251_v29 = vld [vmem:[#allocation3 + $0xb0] sm:$0xff] }
 0x295   : > { %v1140_v16 = vmax.f32 %v1137_v30, 0.0  ;;  %v1141_v33 = vmax.f32 %v1138_v32, 0.0 }
 0x297   : > { %1148 = vrot.lane.b32.xlu0 %v1141_v33, %s2070_s15  ;;  %v1145_v18 = vcombine.low %v1139_v31, %v1140_v16 }
 0x299   : > { %1146 = vrot.lane.b32.xlu1 %v1145_v18, %s2070_s15  ;;  %s2642_s15 = smov 94   ;;  %v1811_v18 = vld [vmem:[%s2627_s4 + $0x24] sm:$0xf] }
 0x29b   : > { %1201 = vrot.lane.b32.xlu0 %v1199_v34, %s2076_s17  ;;  %s2654_s17 = smov 124  }
 0x29d   : > { %1175 = vrot.lane.b32.xlu1 %v1173_v35, %s2061_s20  ;;  %v1810_v35 = vld [vmem:[%s2627_s4 + $0x20] sm:$0xf] }
 0x29f   : > { %1267 = vrot.lane.b32.xlu0 %v1265_v38, %s2077_s21  ;;  %s2083_s21 = smov 62   ;;  %v1813_v38 = vld [vmem:[%s2627_s4 + $0x2c] sm:$0xf] }
 0x2a1   : > { %1227 = vrot.lane.b32.xlu1 %v1225_v39, %s2078_s9 }
 0x2a3   : > { %1318 = vrot.lane.b32.xlu0 %v1316_v40, %s2653_s8  ;;  %v1636_v40 = vld [vmem:[%s2245_s16] sm:$0xff]  ;;  %s1558_s16 = sld [smem:[#allocation7]] }
 0x2a5   : > { %1293 = vrot.lane.b32.xlu1 %v1291_v41, %s2079_s18  ;;  %v1812_v41 = vld [vmem:[%s2627_s4 + $0x28] sm:$0xf] }
 0x2a7   : > { %1161 = vrot.lane.b32.xlu0 %v1159_v42, %s2642_s15 }
 0x2a9   : > { %1343 = vrot.lane.b32.xlu1 %v1341_v43, %s2640_s14  ;;  %v1814_v43 = vld [vmem:[%s2628_s5 + $0x8] sm:$0xf]  ;;  %s1816_s14 = sld [smem:[#allocation7 + $0x2]] }
 0x2ab   : > { %1369 = vperm.xlu0 %1921, %v1809_v44  }
 0x309   : > { %v1149_v45 = vpop.permute.xlu0 %1148 }
 0x30a   : > { %v1151_v47 = vrot.slane %v1149_v45, 4 }
 0x30b   : > { %v1147_v46 = vpop.permute.xlu1 %1146 }
 0x30c   : > { %v1150_v48 = vrot.slane %v1147_v46, 4 }
 0x30d   : > { %v1202_v36 = vpop.permute.xlu0 %1201 }
 0x30e   : > { %v1152_v49 = vsel %vm365_vm7, %v1150_v48, %v1151_v47  ;;  %v1203_v63 = vrot.slane %v1202_v36, 4 }
 0x30f   : > { %v1153_v37 = vsel %vm799_vm14, %v1147_v46, %v1152_v49  ;;  %v1176_v51 = vpop.permute.xlu1 %1175  ;;  %vm1333_vm14 = vcmask 506880  }
 0x310   : > { %1155 = vst [vmem:[#allocation2 + $0x4] sm:$0xff] %v1153_v37  ;;  %v1177_v57 = vrot.slane %v1176_v51, 4  ;;  %v1205_v23 = vsel %vm1204_vm8, %v1203_v63, %v1202_v36  ;;  %v1252_v32 = vmul.f32 %v1251_v29, %v1153_v37 }
 0x311   : > { %v1268_v53 = vpop.permute.xlu0 %1267 }
 0x312   : > { %v1269_v54 = vrot.slane %v1268_v53, 4  ;;  %v1178_v10 = vsel %vm499_vm5, %v1177_v57, %v1176_v51 }
 0x313   : > { %v1228_v55 = vpop.permute.xlu1 %1227 }
 0x314   : > { %v1275_v56 = vmul.f32 %v1269_v54, %v1263_v52  ;;  %v1229_v6 = vrot.slane %v1228_v55, 4  ;;  %v1271_v13 = vsel %vm1270_vm6, %v1269_v54, %v1268_v53 }
 0x315   : > { %v1319_v7 = vpop.permute.xlu0 %1318  ;;  %v1274_v24 = vmul.f32 %v1271_v13, %v1153_v37 }
 0x316   : > { %1280 = vrot.lane.b32.xlu1 %v1275_v56, %s2082_s23  ;;  %v1320_v19 = vrot.slane %v1319_v7, 4  ;;  %v1230_v25 = vsel %vm1192_vm9, %v1229_v6, %v1228_v55 }
 0x317   : > { %v2477_v60 = vld [vmem:[#allocation2 + $0x8] sm:$0xf]  ;;  %v1294_v61 = vpop.permute.xlu1 %1293  ;;  %v2482_v3 = vld [vmem:[#allocation2] sm:$0xff] }
 0x318   : > { %v1182_v62 = vmul.f32 %v1177_v57, %v2477_v60  ;;  %v1295_v0 = vrot.slane %v1294_v61, 4  ;;  %v1209_v1 = vmul.f32 %v1203_v63, %v2477_v60  ;;  %v1181_v58 = vmul.f32 %v1178_v10, %v2482_v3 }
 0x319   : > { %v1234_v12 = vmul.f32 %v1229_v6, %v2477_v60  ;;  %v1208_v59 = vmul.f32 %v1205_v23, %v2482_v3  ;;  %v1321_v14 = vsel %vm351_vm0, %v1320_v19, %v1319_v7  ;;  %v1233_v26 = vmul.f32 %v1230_v25, %v2482_v3  ;;  %v1162_v45 = vpop.permute.xlu0 %1161 }
 0x31a   : > { %1187 = vrot.lane.b32.xlu0 %v1182_v62, %s2078_s9  ;;  %v1301_v2 = vmul.f32 %v1295_v0, %v1263_v52  ;;  %v1324_v27 = vmul.f32 %v1321_v14, %v1153_v37  ;;  %v1297_v31 = vsel %vm1296_vm12, %v1295_v0, %v1294_v61  ;;  %v1325_v34 = vmul.f32 %v1320_v19, %v1263_v52 }
 0x31b   : > { %v1344_v22 = vpop.permute.xlu1 %1343  ;;  %v1300_v33 = vmul.f32 %v1297_v31, %v1153_v37  ;;  %vm1164_vm0 = vcmask 769024  }
 0x31c   : > { %1306 = vrot.lane.b32.xlu1 %v1301_v2, %s2065_s13  ;;  %v1345_v15 = vrot.slane %v1344_v22, 4 }
 0x31e   : > { %1214 = vrot.lane.b32.xlu0 %v1209_v1, %s2654_s17  ;;  %v1347_v28 = vsel %vm1346_vm10, %v1345_v15, %v1344_v22  ;;  %v1351_v16 = vmul.f32 %v1345_v15, %v1263_v52 }
 0x31f   : > { %v1350_v30 = vmul.f32 %v1347_v28, %v1153_v37  ;;  %v1163_v37 = vrot.slane %v1162_v45, 4 }
 0x320   : > { %1185 = vrot.lane.b32.xlu1 %v1181_v58, %s2078_s9  ;;  %s2655_s9 = smov 60  }
 0x321   : > { %v1165_v56 = vsel %vm1164_vm0, %v1163_v37, %v1162_v45  ;;  %v1169_v2 = vmul.f32 %v1163_v37, %v2477_v60 }
 0x322   : > { %1239 = vrot.lane.b32.xlu0 %v1234_v12, %s2061_s20  ;;  %v1168_v1 = vmul.f32 %v1165_v56, %v2482_v3 }
 0x324   : > { %1212 = vrot.lane.b32.xlu1 %v1208_v59, %s2654_s17  ;;  %s1828_s17 = sshll.u32 %s2146_s28, 7  ;;  %s1678_s28 = scalar_lea.sflag [#allocation5], %s313_s22 }
 0x325   : > { %s2580_s8 = scalar_lea.hbm %s2630_s7, %s1828_s17 }
 0x326   : > { %1278 = vrot.lane.b32.xlu0 %v1274_v24, %s2082_s23 }
 0x328   : > { %1237 = vrot.lane.b32.xlu1 %v1233_v26, %s2061_s20  ;;  %s2656_s20 = sshll.u32 %s2237_s19, 3  ;;  %s2657_s19 = smov 94  }
 0x329   : > { %s325_s23 = scalar_lea.vmem %s2624_s1, %s2656_s20  ;;  %s1817_s20 = sld [smem:[#allocation7 + $0x3]] }
 0x32a   : > { %1328 = vrot.lane.b32.xlu0 %v1324_v27, %s2083_s21  ;;  %v1635_v39 = vld [vmem:[%s325_s23] sm:$0xff]  ;;  %v2526_v46 = vpop.permute.xlu0 %1369  ;;  %s1795_s23 = sshll.u32 %s313_s22, 3 }
 0x32b   : > { %v1637_v42 = vadd.f32 %v1636_v40, %v1635_v39 }
 0x32c   : > { %1254 = vrot.lane.b32.xlu1 %v1252_v32, %s2642_s15  ;;  %s1815_s15 = sld [smem:[#allocation7 + $0x1]] }
 0x32d   : > { %v1651_v44 = vcombine.high %v1637_v42, %v1637_v42 }
 0x32e   : > { %1354 = vrot.lane.b32.xlu0 %v1350_v30, %s2655_s9 }
 0x330   : > { %1304 = vrot.lane.b32.xlu1 %v1300_v33, %s2065_s13  ;;  %s315_s13 = scalar_lea.vmem [#allocation8], %s1795_s23 }
 0x332   : > { %1356 = vrot.lane.b32.xlu0 %v1351_v16, %s2655_s9  ;;  %s1692_s9 = sshll.u32 %s315_s13, 4  ;;  %s2582_s9 = int_to_ptr.vmem [resolvable:$true] %s1692_s9 }
 0x333   : > { %s1978_s18 = scalar_lea.vmem %s2582_s9, 128 }
 0x334   : > { %1330 = vrot.lane.b32.xlu1 %v1325_v34, %s2083_s21  ;;  %p1979_p11 = scmp.ne.s32.totalorder %s2582_s9, %s1978_s18 }
 0x336   : > { %1429 = vperm.xlu0 %1921, %v1811_v18   ;;  %p1980_p1 = pnand %p1979_p11, %p2659_p13 }
 0x338   : > { %1387 = vperm.xlu1 %1922, %v1810_v35   ;;  %p1981_p6 = pneg %p1980_p1 }
 0x33a   : > { %1509 = vperm.xlu0 %1921, %v1813_v38  }
 0x33c   : > { %1469 = vperm.xlu1 %1922, %v1812_v41  }
 0x33e   : > { %1652 = vrot.lane.b32.xlu0 %v1637_v42, %s2657_s19 }
 0x340   : > { %1549 = vperm.xlu1 %1922, %v1814_v43  }
 0x344   : > { %1654 = vrot.lane.b32.xlu1 %v1651_v44, %s2657_s19 }
 0x388   : > { %v1281_v47 = vpop.permute.xlu1 %1280 }
 0x38c   : > { %v1188_v48 = vpop.permute.xlu0 %1187 }
 0x38d   : > { %v1190_v53 = vrot.slane %v1188_v48, 4  ;;  %v1197_v12 = vadd.f32 %v1188_v48, %v1169_v2 }
 0x38e   : > { %v1307_v36 = vpop.permute.xlu1 %1306 }
 0x390   : > { %v1215_v49 = vpop.permute.xlu0 %1214 }
 0x391   : > { %v1217_v62 = vrot.slane %v1215_v49, 4  ;;  %v1223_v23 = vadd.f32 %v1215_v49, %v1197_v12 }
 0x392   : > { %v1186_v51 = vpop.permute.xlu1 %1185 }
 0x393   : > { %v1189_v54 = vrot.slane %v1186_v51, 4 }
 0x394   : > { %v1240_v52 = vpop.permute.xlu0 %1239 }
 0x395   : > { %v1191_v55 = vsel %vm365_vm7, %v1189_v54, %v1190_v53  ;;  %v1242_v19 = vrot.slane %v1240_v52, 4  ;;  %v1248_v15 = vadd.f32 %v1240_v52, %v1223_v23  ;;  %v1377_v52 = vrot.slane %v2526_v46, %v2308_v50 }
 0x396   : > { %v1213_v57 = vpop.permute.xlu1 %1212  ;;  %v1193_v0 = vsel %vm1192_vm9, %v1186_v51, %v1191_v55 }
 0x397   : > { %v1216_v63 = vrot.slane %v1213_v57, 4  ;;  %v1196_v13 = vadd.f32 %v1193_v0, %v1168_v1 }
 0x398   : > { %v1279_v61 = vpop.permute.xlu0 %1278 }
 0x399   : > { %v1218_v6 = vsel %vm365_vm7, %v1216_v63, %v1217_v62  ;;  %v1282_v25 = vrot.slane %v1279_v61, 4 }
 0x39a   : > { %v1219_v7 = vsel %vm787_vm15, %v1213_v57, %v1218_v6  ;;  %v1238_v10 = vpop.permute.xlu1 %1237 }
 0x39b   : > { %v1241_v22 = vrot.slane %v1238_v10, 4  ;;  %v1222_v59 = vadd.f32 %v1219_v7, %v1196_v13  ;;  %v1285_v30 = vsel %vm1283_vm13, %v1282_v25, %v1281_v47  ;;  %v1284_v16 = vsel %vm1283_vm13, %v1282_v25, %v1279_v61 }
 0x39c   : > { %v1329_v58 = vpop.permute.xlu0 %1328 }
 0x39d   : > { %v1243_v24 = vsel %vm365_vm7, %v1241_v22, %v1242_v19  ;;  %v1332_v33 = vrot.slane %v1329_v58, 4 }
 0x39e   : > { %v1244_v14 = vsel %vm499_vm5, %v1238_v10, %v1243_v24  ;;  %v1255_v3 = vpop.permute.xlu1 %1254 }
 0x39f   : > { %v1247_v60 = vadd.f32 %v1244_v14, %v1222_v59  ;;  %v1256_v26 = vrot.slane %v1255_v3, 4  ;;  %v1334_v45 = vsel %vm1333_vm14, %v1332_v33, %v1329_v58 }
 0x3a0   : > { %v1355_v27 = vpop.permute.xlu0 %1354 }
 0x3a1   : > { %v1257_v28 = vsel %vm1164_vm0, %v1256_v26, %v1255_v3  ;;  %v1261_v29 = vadd.f32 %v1256_v26, %v1248_v15  ;;  %v1358_v38 = vrot.slane %v1355_v27, 4 }
 0x3a2   : > { %v1260_v32 = vadd.f32 %v1257_v28, %v1247_v60  ;;  %v1305_v31 = vpop.permute.xlu1 %1304 }
 0x3a3   : > { %v1289_v18 = vadd.f32 %v1285_v30, %v1261_v29  ;;  %v1308_v34 = vrot.slane %v1305_v31, 4  ;;  %v1359_v37 = vsel %vm759_vm2, %v1358_v38, %v1355_v27 }
 0x3a4   : > { %v1288_v35 = vadd.f32 %v1284_v16, %v1260_v32  ;;  %v1357_v42 = vpop.permute.xlu0 %1356 }
 0x3a5   : > { %v1309_v39 = vsel %vm487_vm11, %v1308_v34, %v1305_v31  ;;  %v1310_v40 = vsel %vm487_vm11, %v1308_v34, %v1307_v36  ;;  %v1360_v51 = vsel %vm759_vm2, %v1358_v38, %v1357_v42 }
 0x3a6   : > { %v1313_v41 = vadd.f32 %v1309_v39, %v1288_v35  ;;  %v1314_v43 = vadd.f32 %v1310_v40, %v1289_v18  ;;  %v1331_v44 = vpop.permute.xlu1 %1330 }
 0x3a7   : > { %v1335_v48 = vsel %vm1333_vm14, %v1332_v33, %v1331_v44 }
 0x3a8   : > { %v1338_v47 = vadd.f32 %v1334_v45, %v1313_v41  ;;  %v1339_v49 = vadd.f32 %v1335_v48, %v1314_v43 }
 0x3aa   : > { %v1363_v53 = vadd.f32 %v1359_v37, %v1338_v47  ;;  %v1364_v54 = vadd.f32 %v1360_v51, %v1339_v49  ;;  %v1559_v49 = vstv %s1558_s16  ;;  %v1567_v37 = vstv %s1815_s15  ;;  %s2084_s16 = smov [#allocation8]  }
 0x3ab   : > { %v1584_v51 = vstv %s1816_s14  ;;  %s1982_s15 = sshll.u32 %s2084_s16, 4  ;;  %s1983_s15 = int_to_ptr.vmem [resolvable:$false] %s1982_s15 }
 0x3ac   : > { %v1379_v55 = vadd.f32 %v1377_v52, %v1363_v53  ;;  %v1380_v56 = vadd.f32 %v1377_v52, %v1364_v54  ;;  %s1984_s14 = scalar_lea.vmem %s1983_s15, 256  ;;  %p1985_p5 = scmp.lt.s32.totalorder %s2582_s9, %s1983_s15 }
 0x3ad   : > { %p1986_p9 = scmp.lt.s32.totalorder %s1984_s14, %s1978_s18 }
 0x3ae   : > { %v1381_v36 = vmax.f32 %v1379_v55, 0.0  ;;  %v1382_v57 = vmax.f32 %v1380_v56, 0.0  ;;  %v1601_v55 = vstv %s1817_s20 }
 0x3af   : > { %p1987_p10 = por %p1986_p9, %p1985_p5 }
 0x3b0   : > { %v1395_v61 = vrot.slane %v1381_v36, %v2315_v4  ;;  %v1399_v62 = vrot.slane %v1381_v36, %v2321_v9  ;;  %v1403_v63 = vrot.slane %v1382_v57, %v2315_v4  ;;  %v1435_v0 = vrot.slane %v1381_v36, %v2317_v5 }
 0x3b1   : > { %v1439_v1 = vrot.slane %v1381_v36, %v2319_v8  ;;  %v1443_v6 = vrot.slane %v1382_v57, %v2317_v5  ;;  %v1515_v7 = vrot.slane %v1381_v36, %v2335_v21  ;;  %v1475_v58 = vrot.slane %v1381_v36, %v2323_v11  ;;  %p1988_p2 = pnand %p1987_p10, %p1981_p6 }
 0x3b2   : > { %v1410_v50 = vrot.slane %v1395_v61, %v2315_v4  ;;  %v1414_v46 = vrot.slane %v1399_v62, %v2315_v4  ;;  %v1418_v10 = vrot.slane %v1403_v63, %v2315_v4  ;;  %v1479_v9 = vrot.slane %v1381_v36, %v2333_v20 }
 0x3b3   : > { %v1483_v12 = vrot.slane %v1382_v57, %v2323_v11  ;;  %v1450_v13 = vrot.slane %v1435_v0, %v2317_v5  ;;  %v1454_v8 = vrot.slane %v1439_v1, %v2317_v5  ;;  %v1519_v22 = vrot.slane %v1381_v36, %v2329_v17 }
 0x3b4   : > { %v1523_v23 = vrot.slane %v1382_v57, %v2335_v21  ;;  %v1458_v59 = vrot.slane %v1443_v6, %v2317_v5  ;;  %v1530_v20 = vrot.slane %v1515_v7, %v2335_v21  ;;  %v1490_v27 = vrot.slane %v1475_v58, %v2323_v11 }
 0x3b5   : > { %v1430_v2 = vpop.permute.xlu0 %1429  ;;  %v1494_v28 = vrot.slane %v1479_v9, %v2323_v11  ;;  %v1498_v29 = vrot.slane %v1483_v12, %v2323_v11  ;;  %v1534_v32 = vrot.slane %v1519_v22, %v2335_v21 }
 0x3b6   : > { %v1459_v3 = vmul.f32 %v1450_v13, %v1430_v2  ;;  %v1460_v15 = vmul.f32 %v1454_v8, %v1430_v2  ;;  %v1461_v60 = vmul.f32 %v1458_v59, %v1430_v2  ;;  %v1538_v5 = vrot.slane %v1523_v23, %v2335_v21 }
 0x3b7   : > { %v1388_v19 = vpop.permute.xlu1 %1387 }
 0x3b8   : > { %v1419_v24 = vmul.f32 %v1410_v50, %v1388_v19  ;;  %v1420_v25 = vmul.f32 %v1414_v46, %v1388_v19  ;;  %v1421_v14 = vmul.f32 %v1418_v10, %v1388_v19 }
 0x3b9   : > { %v1510_v26 = vpop.permute.xlu0 %1509 }
 0x3ba   : > { %v1462_v17 = vadd.f32 %v1459_v3, %v1419_v24  ;;  %v1463_v30 = vadd.f32 %v1460_v15, %v1420_v25  ;;  %v1464_v16 = vadd.f32 %v1461_v60, %v1421_v14  ;;  %v1539_v35 = vmul.f32 %v1530_v20, %v1510_v26 }
 0x3bb   : > { %v1470_v31 = vpop.permute.xlu1 %1469  ;;  %v1540_v38 = vmul.f32 %v1534_v32, %v1510_v26  ;;  %v1541_v39 = vmul.f32 %v1538_v5, %v1510_v26 }
 0x3bc   : > { %v1499_v33 = vmul.f32 %v1490_v27, %v1470_v31  ;;  %v1500_v18 = vmul.f32 %v1494_v28, %v1470_v31  ;;  %v1501_v34 = vmul.f32 %v1498_v29, %v1470_v31 }
 0x3be   : > { %v1502_v40 = vadd.f32 %v1499_v33, %v1462_v17  ;;  %v1503_v11 = vadd.f32 %v1500_v18, %v1463_v30  ;;  %v1504_v41 = vadd.f32 %v1501_v34, %v1464_v16  ;;  %v1653_v16 = vpop.permute.xlu0 %1652 }
 0x3bf   : > { %v1550_v45 = vpop.permute.xlu1 %1549 }
 0x3c0   : > { %v1542_v42 = vadd.f32 %v1539_v35, %v1502_v40  ;;  %v1543_v43 = vadd.f32 %v1540_v38, %v1503_v11  ;;  %v1544_v44 = vadd.f32 %v1541_v39, %v1504_v41 }
 0x3c2   : > { %v1552_v21 = vadd.f32 %v1550_v45, %v1542_v42  ;;  %v1553_v48 = vadd.f32 %v1550_v45, %v1543_v43  ;;  %v1554_v47 = vadd.f32 %v1550_v45, %v1544_v44 }
 0x3c3   : > { %v1655_v33 = vpop.permute.xlu1 %1654 }
 0x3c4   : > { %v1555_v52 = vmax.f32 %v1552_v21, 0.0  ;;  %v1556_v53 = vmax.f32 %v1553_v48, 0.0  ;;  %v1557_v54 = vmax.f32 %v1554_v47, 0.0  ;;  %v1656_v38 = vsel %vm1164_vm0, %v1653_v16, %v1655_v33 }
 0x3c6   : > { %v1560_v56 = vmul.f32 %v1559_v49, %v1555_v52  ;;  %v1568_v36 = vmul.f32 %v1567_v37, %v1555_v52  ;;  %v1569_v57 = vmul.f32 %v1567_v37, %v1556_v53  ;;  %v1570_v61 = vmul.f32 %v1567_v37, %v1557_v54 }
 0x3c7   : > { %v1585_v62 = vmul.f32 %v1584_v51, %v1555_v52  ;;  %v1586_v63 = vmul.f32 %v1584_v51, %v1556_v53  ;;  %v1561_v0 = vmul.f32 %v1559_v49, %v1556_v53  ;;  %v1587_v2 = vmul.f32 %v1584_v51, %v1557_v54 }
 0x3c8   : > { %v1574_v1 = vrot.slane %v1568_v36, 1  ;;  %v1602_v6 = vmul.f32 %v1601_v55, %v1555_v52  ;;  %v1562_v50 = vmul.f32 %v1559_v49, %v1557_v54  ;;  %v1575_v46 = vrot.slane %v1569_v57, 1 }
 0x3c9   : > { %v1576_v7 = vrot.slane %v1570_v61, 1  ;;  %v1603_v10 = vmul.f32 %v1601_v55, %v1556_v53  ;;  %v1591_v9 = vrot.slane %v1585_v62, 2  ;;  %v1604_v12 = vmul.f32 %v1601_v55, %v1557_v54 }
 0x3ca   : > { %v1580_v58 = vadd.f32 %v1574_v1, %v1560_v56  ;;  %v1581_v13 = vadd.f32 %v1575_v46, %v1561_v0  ;;  %v1592_v19 = vrot.slane %v1586_v63, 2  ;;  %v1593_v22 = vrot.slane %v1587_v2, 2 }
 0x3cb   : > { %v1582_v8 = vadd.f32 %v1576_v7, %v1562_v50  ;;  %v1608_v59 = vrot.slane %v1602_v6, 3  ;;  %v1609_v14 = vrot.slane %v1603_v10, 3  ;;  %v1610_v3 = vrot.slane %v1604_v12, 3 }
 0x3cc   : > { %v1597_v23 = vadd.f32 %v1591_v9, %v1580_v58  ;;  %v1598_v24 = vadd.f32 %v1592_v19, %v1581_v13 }
 0x3cd   : > { %v1599_v25 = vadd.f32 %v1593_v22, %v1582_v8 }
 0x3ce   : > { %v1614_v15 = vadd.f32 %v1608_v59, %v1597_v23  ;;  %v1615_v20 = vadd.f32 %v1609_v14, %v1598_v24 }
 0x3cf   : > { %v1616_v60 = vadd.f32 %v1610_v3, %v1599_v25 }
 0x3d0   : > { %v1818_v26 = vmul.f32 -1.442695, %v1614_v15  ;;  %v1819_v27 = vmul.f32 -1.442695, %v1615_v20 }
 0x3d1   : > { %v1820_v28 = vmul.f32 -1.442695, %v1616_v60 }
 0x3d2   : > { %1923 = vpow2.f32 %v1818_v26 }
 0x3d3   : > { %1925 = vpow2.f32 %v1819_v27 }
 0x3d4   : > { %1927 = vpow2.f32 %v1820_v28 }
 0x3dc   : > { %v1924_v29 = vpop.eup %1923 }
 0x3dd   : > { %v1926_v17 = vpop.eup %1925  ;;  %v1626_v30 = vadd.f32 1.0, %v1924_v29 }
 0x3de   : > { %v1928_v32 = vpop.eup %1927  ;;  %v1627_v5 = vadd.f32 1.0, %v1926_v17 }
 0x3df   : > { %1929 = vrcp.f32 %v1626_v30  ;;  %v1628_v31 = vadd.f32 1.0, %v1928_v32 }
 0x3e0   : > { %1931 = vrcp.f32 %v1627_v5 }
 0x3e1   : > { %1933 = vrcp.f32 %v1628_v31 }
 0x3e9   : > { %v1930_v18 = vpop.eup %1929 }
 0x3ea   : > { %v1932_v34 = vpop.eup %1931  ;;  %v1641_v35 = vrot.slane %v1930_v18, %v2315_v4 }
 0x3eb   : > { %v1934_v39 = vpop.eup %1933  ;;  %v1645_v40 = vrot.slane %v1932_v34, %v2315_v4 }
 0x3ec   : > { %v1660_v11 = vmul.f32 %v1653_v16, %v1641_v35  ;;  %v1649_v41 = vrot.slane %v1934_v39, %v2315_v4 }
 0x3ed   : > { %v1661_v42 = vmul.f32 %v1656_v38, %v1645_v40 }
 0x3ee   : > { %v1662_v43 = vmul.f32 %v1655_v33, %v1649_v41 }
 0x3ef   : > { %v1666_v44 = vcombine.low %v1660_v11, %v1661_v42 }
 0x3f0   : > { %1669 = vrot.lane.b32.xlu1 %v1662_v43, %s2658_s29 }
 0x3f1   : > { %1667 = vrot.lane.b32.xlu0 %v1666_v44, %s2658_s29 }
 0x462   : > { %v1670_v45 = vpop.permute.xlu1 %1669 }
 0x463   : > { %v1668_v21 = vpop.permute.xlu0 %1667  ;;  %v1672_v48 = vrot.slane %v1670_v45, 4 }
 0x464   : > { %v1671_v47 = vrot.slane %v1668_v21, 4 }
 0x466   : > { %v1673_v49 = vsel %vm365_vm7, %v1671_v47, %v1672_v48 }
 0x467   : > { %v1674_v4 = vsel %vm1346_vm10, %v1668_v21, %v1673_v49 }
 0x468   : > { %1676 = vst [vmem:[%s315_s13] sm:$0xff] %v1674_v4 }
 0x469   : > { %1991 = shalt.err (!%p1988_p2)
}
 0x46a   : > { %s1992_s20 = scalar_lea.hbm %s2580_s8, 128  ;;  %s1996_s23 = scalar_lea.hbm %s2630_s7, 256 }
 0x46b   : > { %p1993_p3 = scmp.ne.s32.totalorder %s2580_s8, %s1992_s20  ;;  %p1997_p7 = scmp.lt.u32.totalorder %s2580_s8, %s2630_s7 }
 0x46c   : > { %p1998_p8 = scmp.lt.u32.totalorder %s1996_s23, %s1992_s20  ;;  %p2000_p11 = scmp.lt.u32.totalorder %s1992_s20, %s2580_s8 }
 0x46d   : > { %p1994_p4 = pnand %p1993_p3, %p2659_p13 }
 0x46e   : > { %p1999_p12 = por %p1998_p8, %p1997_p7 }
 0x46f   : > { %p1995_p0 = pneg %p1994_p4 }
 0x470   : > { %p2001_p1 = por %p2000_p11, %p1999_p12 }
 0x472   : > { %p2002_p6 = pnand %p2001_p1, %p1995_p0 }
 0x474   : > { %2005 = shalt.err (!%p2002_p6)
}
 0x475   : > { %1837 = dma.vmem_to_hbm [thread:$0]  (%p2659_p13), %s2582_s9, 128, %s2580_s8, %s1678_s28  }
 0x476 PF: > { %p1854_p5 = scmp.ge.s32.totalorder %s2048_s27, 2  ;;  %s1704_s21 = sand.u32 1, %s2036_s24  }
 0x477   : > { %p2660_p9 = scmp.ne.s32.totalorder %s2645_s12, 0  ;;  %s1705_s19 = scalar_lea.sflag [#allocation5], %s1704_s21 }
 0x479   : > { %p1847_p10 = pnand %p1854_p5, %p2660_p9 }
 0x47b   : > { %2031 = dma.done.wait (!%p1847_p10), %s1705_s19, 128  }
 0x47c   : > { %2033 = vsyncadd (!%p1847_p10), %s1705_s19, 4294967168  ;;  %p19_p2 = scmp.ge.s32.totalorder %s2150_s30, 4   ;;  %s2661_s24 = smov %s2040_s25 }
 0x47d   : > { %s2662_s25 = smov %s2044_s26  ;;  %s2663_s26 = smov %s2161_s10 }
 0x47e   : > { %s2664_s27 = smov %s2150_s30  ;;  %21 = sbr.rel (!%p19_p2) target bundleno = 5 (0x5), region = 137 }
 0x485   :  { %1710 = vsyncpa [#allocation4], 1 }
 0x486   :  { %1712 = vsyncpa [#allocation4 + $0x1], 1 }
 0x487   :  { %1713 = vsyncpa [#allocation5], 1 }
 0x488   :  { %1715 = vsyncpa [#allocation5 + $0x1], 1 }
 0x489   :  { %1716 = vsyncpa [#allocation6], 1 }
 0x48a   :  { %1718 = vsyncpa [#allocation6 + $0x1], 1 }

</bundles_post_ra>
